<compile_context>
chip_gen: v6e
topology: v6e:2x2x1
jax: 0.10.0
libtpu: 0.0.40
codegen_flags: <defaults>
</compile_context>

<pallas_src>
import math
import numpy as np
import jax
import jax.numpy as jnp
from jax import lax
from jax.experimental import pallas as pl
from jax.experimental.pallas import tpu as pltpu


def _round_up(v, m):
    return ((v + m - 1) // m) * m


def _make_kernel(K, C_in, C_out, Ca, Wp, R, pad, KC, KC2, KC2p, eps, approx):
    def kernel(*refs):
        x_refs = refs[:K]          # K shifted depth planes, each (Ca, L) flattened
        rhs_ref = refs[K]          # (NCp, KC2p) fused transposed weight block
        bias_ref = refs[K + 1]     # (C_out, 1) f32
        out_ref = refs[K + 2]      # (C_out, R) f32 output plane (lane-dense)
        lhs_ref = refs[K + 3]      # (KC2p, R) scratch: in-VMEM im2col, R on lanes

        # keep alignment-pad rows zero so the fused matmul never multiplies garbage
        if KC2p > KC2:
            lhs_ref[KC2:KC2p, :] = jnp.zeros((KC2p - KC2, R), lhs_ref.dtype)

        # in-VMEM im2col: the padded plane is flattened with row width Wp == output row
        # width, so every (kh, kw) window is a contiguous R-length lane slice (pure shift).
        for kh in range(K):
            for kw in range(K):
                off = (pad - kh) * Wp + (pad - kw)
                q = kh * K + kw
                for j in range(K):                          # plane j <-> kd = pad - j
                    base = (q * K + j) * Ca
                    piece = x_refs[j][:, off:off + R]       # (Ca, R) lane-dense load
                    lhs_ref[base:base + Ca, :] = piece      # lane-dense store
                    xr = piece[:C_in, :]
                    sq_base = KC + (q * K + j) * C_in
                    lhs_ref[sq_base:sq_base + C_in, :] = xr * xr   # x^2 rows -> MXU reduce

        # one fused MXU pass; result rows =
        #   [conv(gamma*W) | ConvT(gamma*1) | ConvT(beta*1) | sum_x | count | sum_x2 | 0-pad]
        acc = jnp.dot(rhs_ref[...], lhs_ref[...], preferred_element_type=jnp.float32)

        conv = acc[0:C_out, :]
        g_ks = acc[C_out:2 * C_out, :]
        b_ks = acc[2 * C_out:3 * C_out, :]
        sum_x = acc[3 * C_out:3 * C_out + 1, :]
        count = acc[3 * C_out + 1:3 * C_out + 2, :]
        sum_x2 = acc[3 * C_out + 2:3 * C_out + 3, :]

        voxels = float(C_in) * count
        inv_vox = pl.reciprocal(jnp.maximum(voxels, 1.0), approx=approx)
        means = sum_x * inv_vox
        sq_means = sum_x2 * inv_vox
        var = jnp.maximum(sq_means - means * means, 0.0) + eps
        vc = jnp.maximum(voxels, 2.0)
        # stds = sqrt(vc/(vc-1)) * sqrt(var)  ->  1/stds = rsqrt(var * vc/(vc-1))
        inv_std = lax.rsqrt(var * vc * pl.reciprocal(vc - 1.0, approx=approx))

        res = (conv - means * g_ks) * inv_std + b_ks + bias_ref[...]
        out_ref[...] = res.astype(out_ref.dtype)

    return kernel


def nhn_conv3d_transpose(x, weight, gamma, beta, bias, *, kernel_size,
                         epsilon=1e-5, compute_dtype=jnp.bfloat16):
    """x: (N, C_in, D, H, W) f32.  weight: (K^3, C_in, C_out) (Minkowski layout)."""
    K = kernel_size
    N, C_in, D, H, W = x.shape
    C_out = weight.shape[-1]
    pad = K - 1
    Ca = C_in + 1
    Do, Ho, Wo = D + pad, H + pad, W + pad
    Dp, Hp = D + 2 * pad, H + 2 * pad

    # lane geometry: flattened padded plane; output row width == padded input row width Wp,
    # chosen so R = Ho*Wp is a multiple of 128 (dense, unmasked lane stores end-to-end).
    step = 128 // math.gcd(Ho, 128)
    Wp = _round_up(W + 2 * pad, step)
    R = Ho * Wp
    L = _round_up(Hp * Wp + pad, 128)          # flat plane length (covers row-crossing reads)

    KC = K * K * K * Ca                        # regular im2col rows (x channels + ones channel)
    KC2 = KC + K * K * K * C_in                # + squared-channel rows (sum_x2 on the MXU)
    KC2p = _round_up(KC2, 8)
    NC = 3 * C_out + 3                         # conv | g_ks | b_ks | sum_x | count | sum_x2
    NCp = _round_up(NC, 8)

    # ---- input prep: (N, Dp, Ca, L) channel-plane layout, ones channel + zero halo, flat ----
    xcl = jnp.transpose(x, (0, 2, 1, 3, 4)).astype(jnp.float32)           # (N, D, C_in, H, W)
    xa = jnp.concatenate([xcl, jnp.ones((N, D, 1, H, W), jnp.float32)], axis=2)
    xa = jnp.pad(xa, ((0, 0), (pad, pad), (0, 0), (pad, pad), (pad, Wp - W - pad)))
    xa = xa.reshape(N, Dp, Ca, Hp * Wp)
    xa = jnp.pad(xa, ((0, 0), (0, 0), (0, 0), (0, L - Hp * Wp)))
    xa = xa.astype(compute_dtype)                                         # (N, Dp, Ca, L)

    # ---- fused transposed RHS (NCp, KC2p): stats on sublanes, contraction on lanes ----
    w = weight.astype(jnp.float32).reshape(K, K, K, C_in, C_out)          # (kd, kh, kw, ci, co)
    w_qj = jnp.transpose(w[::-1], (1, 2, 0, 3, 4))                        # (kh, kw, j=pad-kd, ci, co)
    gamma32 = gamma.astype(jnp.float32)
    beta32 = beta.astype(jnp.float32)
    gw = (w_qj * gamma32[None, None, None, :, None]).reshape(K * K * K, C_in, C_out)
    gsum = jnp.einsum('i,abjio->abjo', gamma32, w_qj).reshape(K * K * K, C_out)
    bsum = jnp.einsum('i,abjio->abjo', beta32, w_qj).reshape(K * K * K, C_out)

    rhs_reg = jnp.zeros((NCp, K * K * K, Ca), jnp.float32)
    rhs_reg = rhs_reg.at[0:C_out, :, 0:C_in].set(jnp.transpose(gw, (2, 0, 1)))   # conv(gamma*x)
    rhs_reg = rhs_reg.at[C_out:2 * C_out, :, C_in].set(gsum.T)                   # ConvT(gamma*1)
    rhs_reg = rhs_reg.at[2 * C_out:3 * C_out, :, C_in].set(bsum.T)               # ConvT(beta*1)
    rhs_reg = rhs_reg.at[3 * C_out, :, 0:C_in].set(1.0)                          # sum_x
    rhs_reg = rhs_reg.at[3 * C_out + 1, :, C_in].set(1.0)                        # window count
    rhs_sq = jnp.zeros((NCp, K * K * K, C_in), jnp.float32)
    rhs_sq = rhs_sq.at[3 * C_out + 2, :, :].set(1.0)                             # sum_x2
    rhs_T = jnp.concatenate(
        [rhs_reg.reshape(NCp, KC), rhs_sq.reshape(NCp, K * K * K * C_in),
         jnp.zeros((NCp, KC2p - KC2), jnp.float32)], axis=1).astype(compute_dtype)

    bias_col = bias.reshape(C_out, 1).astype(jnp.float32)

    approx = (np.dtype(compute_dtype) != np.dtype(np.float32))
    kern = _make_kernel(K, C_in, C_out, Ca, Wp, R, pad, KC, KC2, KC2p,
                        float(epsilon), approx)

    in_specs = [pl.BlockSpec((None, None, Ca, L), (lambda n, d, j=j: (n, d + j, 0, 0)))
                for j in range(K)]
    in_specs += [pl.BlockSpec((NCp, KC2p), lambda n, d: (0, 0)),       # resident weights
                 pl.BlockSpec((C_out, 1), lambda n, d: (0, 0))]        # resident bias

    # explicit VMEM budget (v7x: 64 MiB physical / 32 MiB scoped default)
    isz = np.dtype(compute_dtype).itemsize
    r8 = lambda v: _round_up(v, 8)
    r128 = lambda v: _round_up(v, 128)
    est = (K * 2 * r8(Ca) * r128(L) * isz            # x blocks (double buffered)
           + 2 * r8(NCp) * r128(KC2p) * isz          # rhs
           + 2 * 8 * 128 * 4                         # bias
           + 2 * r8(C_out) * r128(R) * 4             # output blocks
           + r8(KC2p) * r128(R) * isz                # lhs scratch
           + 8 * r8(NCp) * r128(R) * 4)              # dot result + epilogue temporaries
    vmem_limit = int(min(max(est * 14 // 10, 32 * 2 ** 20), 128 * 2 ** 20))

    out = pl.pallas_call(
        kern,
        out_shape=jax.ShapeDtypeStruct((N, Do, C_out, R), jnp.float32),
        grid_spec=pltpu.PrefetchScalarGridSpec(
            num_scalar_prefetch=0,
            grid=(N, Do),
            in_specs=in_specs,
            out_specs=pl.BlockSpec((None, None, C_out, R), lambda n, d: (n, d, 0, 0)),
            scratch_shapes=[pltpu.VMEM((KC2p, R), compute_dtype)],
        ),
        compiler_params=pltpu.CompilerParams(
            dimension_semantics=("parallel", "parallel"),
            vmem_limit_bytes=vmem_limit),
    )(*([xa] * K), rhs_T, bias_col)

    out = out.reshape(N, Do, C_out, Ho, Wp)[:, :, :, :, :Wo]
    return jnp.transpose(out, (0, 2, 1, 3, 4))                # back to NCDHW


def reference_numpy(x, weight, gamma, beta, bias, kernel_size, epsilon=1e-5):
    """Independent dense f64 reference (scatter formulation of the transposed conv)."""
    x = np.asarray(x, np.float64); w = np.asarray(weight, np.float64)
    gamma = np.asarray(gamma, np.float64); beta = np.asarray(beta, np.float64)
    bias = np.asarray(bias, np.float64)
    K = kernel_size
    N, C_in, D, H, W = x.shape
    C_out = w.shape[-1]
    Do, Ho, Wo = D + K - 1, H + K - 1, W + K - 1
    xcl = np.transpose(x, (0, 2, 3, 4, 1))

    conv = np.zeros((N, Do, Ho, Wo, C_out))
    gsum = np.zeros_like(conv)
    bsum = np.zeros_like(conv)
    sx = np.zeros((N, Do, Ho, Wo))
    sx2 = np.zeros_like(sx)
    cnt = np.zeros_like(sx)

    kidx = 0
    for kd in range(K):
        for kh in range(K):
            for kw in range(K):
                Wk = w[kidx]                                   # (C_in, C_out)
                sl = (slice(None), slice(kd, kd + D), slice(kh, kh + H), slice(kw, kw + W))
                conv[sl] += xcl @ (Wk * gamma[:, None])
                gsum[sl] += gamma @ Wk
                bsum[sl] += beta @ Wk
                sx[sl] += xcl.sum(-1)
                sx2[sl] += (xcl ** 2).sum(-1)
                cnt[sl] += C_in
                kidx += 1

    means = sx / cnt
    sqm = sx2 / cnt
    biased = np.sqrt(np.maximum(sqm - means * means, 0.0) + epsilon)
    vc = np.maximum(cnt, 2.0)
    stds = np.sqrt(vc / (vc - 1.0)) * biased
    out = (conv - means[..., None] * gsum) / stds[..., None] + bsum + bias
    return np.transpose(out, (0, 4, 1, 2, 3))


if __name__ == "__main__":
    N, C_in, C_out, S, K = 2, 4, 8, 6, 3
    eps = 1e-5

    key = jax.random.PRNGKey(0)
    kx, kw, kg, kb, kbias = jax.random.split(key, 5)
    x = jax.random.normal(kx, (N, C_in, S, S, S), dtype=jnp.float32)
    # module parameter shapes: weight (K^3, C_in, C_out), gamma/beta (C_in,), bias (C_out,)
    weight = 0.1 * jax.random.normal(kw, (K * K * K, C_in, C_out), dtype=jnp.float32)
    gamma = 1.0 + 0.1 * jax.random.normal(kg, (C_in,), dtype=jnp.float32)
    beta = 0.1 * jax.random.normal(kb, (C_in,), dtype=jnp.float32)
    bias = 0.1 * jax.random.normal(kbias, (C_out,), dtype=jnp.float32)

    ref = reference_numpy(x, weight, gamma, beta, bias, K, eps)

    # exact-semantics check: f32 compute path, tight tolerance
    out_f32 = jax.block_until_ready(
        nhn_conv3d_transpose(x, weight, gamma, beta, bias, kernel_size=K,
                             epsilon=eps, compute_dtype=jnp.float32))
    np.testing.assert_allclose(np.asarray(out_f32), ref, rtol=2e-4, atol=2e-4)

    # fast path (default): bf16 operands, f32 MXU accumulation — loose statistical check
    out_bf16 = jax.block_until_ready(
        nhn_conv3d_transpose(x, weight, gamma, beta, bias, kernel_size=K, epsilon=eps))
    err = np.abs(np.asarray(out_bf16, np.float64) - ref)
    assert float(err.mean()) < 3e-2 and float(err.max()) < 1.0, (err.mean(), err.max())

    print("KERNEL_OK")
</pallas_src>

<mosaic_0001>
module attributes {stable_mosaic.version = 11 : i64} {
  func.func @kernel(%arg0: i32, %arg1: i32, %arg2: memref<1x1x5x256xf32, #tpu.memory_space<vmem>>, %arg3: memref<1x1x5x256xf32, #tpu.memory_space<vmem>>, %arg4: memref<1x1x5x256xf32, #tpu.memory_space<vmem>>, %arg5: memref<32x248xf32, #tpu.memory_space<vmem>>, %arg6: memref<8x1xf32, #tpu.memory_space<vmem>>, %arg7: memref<1x1x8x128xf32, #tpu.memory_space<vmem>>, %arg8: memref<248x128xf32, #tpu.memory_space<vmem>>) attributes {dimension_semantics = [#tpu.dimension_semantics<parallel>, #tpu.dimension_semantics<parallel>], iteration_bounds = array<i64: 2, 8>, scalar_prefetch = 0 : i64, scratch_operands = 1 : i64, tpu.core_type = #tpu.core_type<tc>, window_params = [{transform_indices = @transform_0, window_bounds = array<i64: 1, 1, 5, 256>}, {transform_indices = @transform_1, window_bounds = array<i64: 1, 1, 5, 256>}, {transform_indices = @transform_2, window_bounds = array<i64: 1, 1, 5, 256>}, {pipeline_mode = #tpu.pipeline_mode<synchronous>, transform_indices = @transform_3, window_bounds = array<i64: 32, 248>}, {pipeline_mode = #tpu.pipeline_mode<synchronous>, transform_indices = @transform_4, window_bounds = array<i64: 8, 1>}, {transform_indices = @transform_5, window_bounds = array<i64: 1, 1, 8, 128>}]} {
    %cst = arith.constant 0.000000e+00 : f32
    %0 = vector.broadcast %cst : f32 to vector<5x128xf32>
    %c243 = arith.constant 243 : index
    %c0 = arith.constant 0 : index
    %1 = vector.load %arg8[%c243, %c0] : memref<248x128xf32, #tpu.memory_space<vmem>>, vector<5x128xf32>
    tpu.vector_store %arg8[%c243, %c0], %0 {strides = array<i32>} : memref<248x128xf32, #tpu.memory_space<vmem>>, vector<5x128xf32>,
    %c0_0 = arith.constant 0 : index
    %c0_1 = arith.constant 0 : index
    %c0_2 = arith.constant 0 : index
    %c34 = arith.constant 34 : index
    %2 = vector.load %arg2[%c0_0, %c0_1, %c0_2, %c34] : memref<1x1x5x256xf32, #tpu.memory_space<vmem>>, vector<1x1x5x128xf32>
    %3 = vector.shape_cast %2 : vector<1x1x5x128xf32> to vector<5x128xf32>
    %c0_3 = arith.constant 0 : index
    %c0_4 = arith.constant 0 : index
    %4 = vector.load %arg8[%c0_3, %c0_4] : memref<248x128xf32, #tpu.memory_space<vmem>>, vector<5x128xf32>
    tpu.vector_store %arg8[%c0_3, %c0_4], %3 {strides = array<i32>} : memref<248x128xf32, #tpu.memory_space<vmem>>, vector<5x128xf32>,
    %5 = vector.extract_strided_slice %3 {offsets = [0, 0], sizes = [4, 128], strides = [1, 1]} : vector<5x128xf32> to vector<4x128xf32>
    %6 = arith.mulf %5, %5 : vector<4x128xf32>
    %c135 = arith.constant 135 : index
    %c0_5 = arith.constant 0 : index
    %7 = vector.load %arg8[%c135, %c0_5] : memref<248x128xf32, #tpu.memory_space<vmem>>, vector<4x128xf32>
    tpu.vector_store %arg8[%c135, %c0_5], %6 {strides = array<i32>} : memref<248x128xf32, #tpu.memory_space<vmem>>, vector<4x128xf32>,
    %c0_6 = arith.constant 0 : index
    %c0_7 = arith.constant 0 : index
    %c0_8 = arith.constant 0 : index
    %c34_9 = arith.constant 34 : index
    %8 = vector.load %arg3[%c0_6, %c0_7, %c0_8, %c34_9] : memref<1x1x5x256xf32, #tpu.memory_space<vmem>>, vector<1x1x5x128xf32>
    %9 = vector.shape_cast %8 : vector<1x1x5x128xf32> to vector<5x128xf32>
    %c5 = arith.constant 5 : index
    %c0_10 = arith.constant 0 : index
    %10 = vector.load %arg8[%c5, %c0_10] : memref<248x128xf32, #tpu.memory_space<vmem>>, vector<5x128xf32>
    tpu.vector_store %arg8[%c5, %c0_10], %9 {strides = array<i32>} : memref<248x128xf32, #tpu.memory_space<vmem>>, vector<5x128xf32>,
    %11 = vector.extract_strided_slice %9 {offsets = [0, 0], sizes = [4, 128], strides = [1, 1]} : vector<5x128xf32> to vector<4x128xf32>
    %12 = arith.mulf %11, %11 : vector<4x128xf32>
    %c139 = arith.constant 139 : index
    %c0_11 = arith.constant 0 : index
    %13 = vector.load %arg8[%c139, %c0_11] : memref<248x128xf32, #tpu.memory_space<vmem>>, vector<4x128xf32>
    tpu.vector_store %arg8[%c139, %c0_11], %12 {strides = array<i32>} : memref<248x128xf32, #tpu.memory_space<vmem>>, vector<4x128xf32>,
    %c0_12 = arith.constant 0 : index
    %c0_13 = arith.constant 0 : index
    %c0_14 = arith.constant 0 : index
    %c34_15 = arith.constant 34 : index
    %14 = vector.load %arg4[%c0_12, %c0_13, %c0_14, %c34_15] : memref<1x1x5x256xf32, #tpu.memory_space<vmem>>, vector<1x1x5x128xf32>
    %15 = vector.shape_cast %14 : vector<1x1x5x128xf32> to vector<5x128xf32>
    %c10 = arith.constant 10 : index
    %c0_16 = arith.constant 0 : index
    %16 = vector.load %arg8[%c10, %c0_16] : memref<248x128xf32, #tpu.memory_space<vmem>>, vector<5x128xf32>
    tpu.vector_store %arg8[%c10, %c0_16], %15 {strides = array<i32>} : memref<248x128xf32, #tpu.memory_space<vmem>>, vector<5x128xf32>,
    %17 = vector.extract_strided_slice %15 {offsets = [0, 0], sizes = [4, 128], strides = [1, 1]} : vector<5x128xf32> to vector<4x128xf32>
    %18 = arith.mulf %17, %17 : vector<4x128xf32>
    %c143 = arith.constant 143 : index
    %c0_17 = arith.constant 0 : index
    %19 = vector.load %arg8[%c143, %c0_17] : memref<248x128xf32, #tpu.memory_space<vmem>>, vector<4x128xf32>
    tpu.vector_store %arg8[%c143, %c0_17], %18 {strides = array<i32>} : memref<248x128xf32, #tpu.memory_space<vmem>>, vector<4x128xf32>,
    %c0_18 = arith.constant 0 : index
    %c0_19 = arith.constant 0 : index
    %c0_20 = arith.constant 0 : index
    %c33 = arith.constant 33 : index
    %20 = vector.load %arg2[%c0_18, %c0_19, %c0_20, %c33] : memref<1x1x5x256xf32, #tpu.memory_space<vmem>>, vector<1x1x5x128xf32>
    %21 = vector.shape_cast %20 : vector<1x1x5x128xf32> to vector<5x128xf32>
    %c15 = arith.constant 15 : index
    %c0_21 = arith.constant 0 : index
    %22 = vector.load %arg8[%c15, %c0_21] : memref<248x128xf32, #tpu.memory_space<vmem>>, vector<5x128xf32>
    tpu.vector_store %arg8[%c15, %c0_21], %21 {strides = array<i32>} : memref<248x128xf32, #tpu.memory_space<vmem>>, vector<5x128xf32>,
    %23 = vector.extract_strided_slice %21 {offsets = [0, 0], sizes = [4, 128], strides = [1, 1]} : vector<5x128xf32> to vector<4x128xf32>
    %24 = arith.mulf %23, %23 : vector<4x128xf32>
    %c147 = arith.constant 147 : index
    %c0_22 = arith.constant 0 : index
    %25 = vector.load %arg8[%c147, %c0_22] : memref<248x128xf32, #tpu.memory_space<vmem>>, vector<4x128xf32>
    tpu.vector_store %arg8[%c147, %c0_22], %24 {strides = array<i32>} : memref<248x128xf32, #tpu.memory_space<vmem>>, vector<4x128xf32>,
    %c0_23 = arith.constant 0 : index
    %c0_24 = arith.constant 0 : index
    %c0_25 = arith.constant 0 : index
    %c33_26 = arith.constant 33 : index
    %26 = vector.load %arg3[%c0_23, %c0_24, %c0_25, %c33_26] : memref<1x1x5x256xf32, #tpu.memory_space<vmem>>, vector<1x1x5x128xf32>
    %27 = vector.shape_cast %26 : vector<1x1x5x128xf32> to vector<5x128xf32>
    %c20 = arith.constant 20 : index
    %c0_27 = arith.constant 0 : index
    %28 = vector.load %arg8[%c20, %c0_27] : memref<248x128xf32, #tpu.memory_space<vmem>>, vector<5x128xf32>
    tpu.vector_store %arg8[%c20, %c0_27], %27 {strides = array<i32>} : memref<248x128xf32, #tpu.memory_space<vmem>>, vector<5x128xf32>,
    %29 = vector.extract_strided_slice %27 {offsets = [0, 0], sizes = [4, 128], strides = [1, 1]} : vector<5x128xf32> to vector<4x128xf32>
    %30 = arith.mulf %29, %29 : vector<4x128xf32>
    %c151 = arith.constant 151 : index
    %c0_28 = arith.constant 0 : index
    %31 = vector.load %arg8[%c151, %c0_28] : memref<248x128xf32, #tpu.memory_space<vmem>>, vector<4x128xf32>
    tpu.vector_store %arg8[%c151, %c0_28], %30 {strides = array<i32>} : memref<248x128xf32, #tpu.memory_space<vmem>>, vector<4x128xf32>,
    %c0_29 = arith.constant 0 : index
    %c0_30 = arith.constant 0 : index
    %c0_31 = arith.constant 0 : index
    %c33_32 = arith.constant 33 : index
    %32 = vector.load %arg4[%c0_29, %c0_30, %c0_31, %c33_32] : memref<1x1x5x256xf32, #tpu.memory_space<vmem>>, vector<1x1x5x128xf32>
    %33 = vector.shape_cast %32 : vector<1x1x5x128xf32> to vector<5x128xf32>
    %c25 = arith.constant 25 : index
    %c0_33 = arith.constant 0 : index
    %34 = vector.load %arg8[%c25, %c0_33] : memref<248x128xf32, #tpu.memory_space<vmem>>, vector<5x128xf32>
    tpu.vector_store %arg8[%c25, %c0_33], %33 {strides = array<i32>} : memref<248x128xf32, #tpu.memory_space<vmem>>, vector<5x128xf32>,
    %35 = vector.extract_strided_slice %33 {offsets = [0, 0], sizes = [4, 128], strides = [1, 1]} : vector<5x128xf32> to vector<4x128xf32>
    %36 = arith.mulf %35, %35 : vector<4x128xf32>
    %c155 = arith.constant 155 : index
    %c0_34 = arith.constant 0 : index
    %37 = vector.load %arg8[%c155, %c0_34] : memref<248x128xf32, #tpu.memory_space<vmem>>, vector<4x128xf32>
    tpu.vector_store %arg8[%c155, %c0_34], %36 {strides = array<i32>} : memref<248x128xf32, #tpu.memory_space<vmem>>, vector<4x128xf32>,
    %c0_35 = arith.constant 0 : index
    %c0_36 = arith.constant 0 : index
    %c0_37 = arith.constant 0 : index
    %c32 = arith.constant 32 : index
    %38 = vector.load %arg2[%c0_35, %c0_36, %c0_37, %c32] : memref<1x1x5x256xf32, #tpu.memory_space<vmem>>, vector<1x1x5x128xf32>
    %39 = vector.shape_cast %38 : vector<1x1x5x128xf32> to vector<5x128xf32>
    %c30 = arith.constant 30 : index
    %c0_38 = arith.constant 0 : index
    %40 = vector.load %arg8[%c30, %c0_38] : memref<248x128xf32, #tpu.memory_space<vmem>>, vector<5x128xf32>
    tpu.vector_store %arg8[%c30, %c0_38], %39 {strides = array<i32>} : memref<248x128xf32, #tpu.memory_space<vmem>>, vector<5x128xf32>,
    %41 = vector.extract_strided_slice %39 {offsets = [0, 0], sizes = [4, 128], strides = [1, 1]} : vector<5x128xf32> to vector<4x128xf32>
    %42 = arith.mulf %41, %41 : vector<4x128xf32>
    %c159 = arith.constant 159 : index
    %c0_39 = arith.constant 0 : index
    %43 = vector.load %arg8[%c159, %c0_39] : memref<248x128xf32, #tpu.memory_space<vmem>>, vector<4x128xf32>
    tpu.vector_store %arg8[%c159, %c0_39], %42 {strides = array<i32>} : memref<248x128xf32, #tpu.memory_space<vmem>>, vector<4x128xf32>,
    %c0_40 = arith.constant 0 : index
    %c0_41 = arith.constant 0 : index
    %c0_42 = arith.constant 0 : index
    %c32_43 = arith.constant 32 : index
    %44 = vector.load %arg3[%c0_40, %c0_41, %c0_42, %c32_43] : memref<1x1x5x256xf32, #tpu.memory_space<vmem>>, vector<1x1x5x128xf32>
    %45 = vector.shape_cast %44 : vector<1x1x5x128xf32> to vector<5x128xf32>
    %c35 = arith.constant 35 : index
    %c0_44 = arith.constant 0 : index
    %46 = vector.load %arg8[%c35, %c0_44] : memref<248x128xf32, #tpu.memory_space<vmem>>, vector<5x128xf32>
    tpu.vector_store %arg8[%c35, %c0_44], %45 {strides = array<i32>} : memref<248x128xf32, #tpu.memory_space<vmem>>, vector<5x128xf32>,
    %47 = vector.extract_strided_slice %45 {offsets = [0, 0], sizes = [4, 128], strides = [1, 1]} : vector<5x128xf32> to vector<4x128xf32>
    %48 = arith.mulf %47, %47 : vector<4x128xf32>
    %c163 = arith.constant 163 : index
    %c0_45 = arith.constant 0 : index
    %49 = vector.load %arg8[%c163, %c0_45] : memref<248x128xf32, #tpu.memory_space<vmem>>, vector<4x128xf32>
    tpu.vector_store %arg8[%c163, %c0_45], %48 {strides = array<i32>} : memref<248x128xf32, #tpu.memory_space<vmem>>, vector<4x128xf32>,
    %c0_46 = arith.constant 0 : index
    %c0_47 = arith.constant 0 : index
    %c0_48 = arith.constant 0 : index
    %c32_49 = arith.constant 32 : index
    %50 = vector.load %arg4[%c0_46, %c0_47, %c0_48, %c32_49] : memref<1x1x5x256xf32, #tpu.memory_space<vmem>>, vector<1x1x5x128xf32>
    %51 = vector.shape_cast %50 : vector<1x1x5x128xf32> to vector<5x128xf32>
    %c40 = arith.constant 40 : index
    %c0_50 = arith.constant 0 : index
    %52 = vector.load %arg8[%c40, %c0_50] : memref<248x128xf32, #tpu.memory_space<vmem>>, vector<5x128xf32>
    tpu.vector_store %arg8[%c40, %c0_50], %51 {strides = array<i32>} : memref<248x128xf32, #tpu.memory_space<vmem>>, vector<5x128xf32>,
    %53 = vector.extract_strided_slice %51 {offsets = [0, 0], sizes = [4, 128], strides = [1, 1]} : vector<5x128xf32> to vector<4x128xf32>
    %54 = arith.mulf %53, %53 : vector<4x128xf32>
    %c167 = arith.constant 167 : index
    %c0_51 = arith.constant 0 : index
    %55 = vector.load %arg8[%c167, %c0_51] : memref<248x128xf32, #tpu.memory_space<vmem>>, vector<4x128xf32>
    tpu.vector_store %arg8[%c167, %c0_51], %54 {strides = array<i32>} : memref<248x128xf32, #tpu.memory_space<vmem>>, vector<4x128xf32>,
    %c0_52 = arith.constant 0 : index
    %c0_53 = arith.constant 0 : index
    %c0_54 = arith.constant 0 : index
    %c18 = arith.constant 18 : index
    %56 = vector.load %arg2[%c0_52, %c0_53, %c0_54, %c18] : memref<1x1x5x256xf32, #tpu.memory_space<vmem>>, vector<1x1x5x128xf32>
    %57 = vector.shape_cast %56 : vector<1x1x5x128xf32> to vector<5x128xf32>
    %c45 = arith.constant 45 : index
    %c0_55 = arith.constant 0 : index
    %58 = vector.load %arg8[%c45, %c0_55] : memref<248x128xf32, #tpu.memory_space<vmem>>, vector<5x128xf32>
    tpu.vector_store %arg8[%c45, %c0_55], %57 {strides = array<i32>} : memref<248x128xf32, #tpu.memory_space<vmem>>, vector<5x128xf32>,
    %59 = vector.extract_strided_slice %57 {offsets = [0, 0], sizes = [4, 128], strides = [1, 1]} : vector<5x128xf32> to vector<4x128xf32>
    %60 = arith.mulf %59, %59 : vector<4x128xf32>
    %c171 = arith.constant 171 : index
    %c0_56 = arith.constant 0 : index
    %61 = vector.load %arg8[%c171, %c0_56] : memref<248x128xf32, #tpu.memory_space<vmem>>, vector<4x128xf32>
    tpu.vector_store %arg8[%c171, %c0_56], %60 {strides = array<i32>} : memref<248x128xf32, #tpu.memory_space<vmem>>, vector<4x128xf32>,
    %c0_57 = arith.constant 0 : index
    %c0_58 = arith.constant 0 : index
    %c0_59 = arith.constant 0 : index
    %c18_60 = arith.constant 18 : index
    %62 = vector.load %arg3[%c0_57, %c0_58, %c0_59, %c18_60] : memref<1x1x5x256xf32, #tpu.memory_space<vmem>>, vector<1x1x5x128xf32>
    %63 = vector.shape_cast %62 : vector<1x1x5x128xf32> to vector<5x128xf32>
    %c50 = arith.constant 50 : index
    %c0_61 = arith.constant 0 : index
    %64 = vector.load %arg8[%c50, %c0_61] : memref<248x128xf32, #tpu.memory_space<vmem>>, vector<5x128xf32>
    tpu.vector_store %arg8[%c50, %c0_61], %63 {strides = array<i32>} : memref<248x128xf32, #tpu.memory_space<vmem>>, vector<5x128xf32>,
    %65 = vector.extract_strided_slice %63 {offsets = [0, 0], sizes = [4, 128], strides = [1, 1]} : vector<5x128xf32> to vector<4x128xf32>
    %66 = arith.mulf %65, %65 : vector<4x128xf32>
    %c175 = arith.constant 175 : index
    %c0_62 = arith.constant 0 : index
    %67 = vector.load %arg8[%c175, %c0_62] : memref<248x128xf32, #tpu.memory_space<vmem>>, vector<4x128xf32>
    tpu.vector_store %arg8[%c175, %c0_62], %66 {strides = array<i32>} : memref<248x128xf32, #tpu.memory_space<vmem>>, vector<4x128xf32>,
    %c0_63 = arith.constant 0 : index
    %c0_64 = arith.constant 0 : index
    %c0_65 = arith.constant 0 : index
    %c18_66 = arith.constant 18 : index
    %68 = vector.load %arg4[%c0_63, %c0_64, %c0_65, %c18_66] : memref<1x1x5x256xf32, #tpu.memory_space<vmem>>, vector<1x1x5x128xf32>
    %69 = vector.shape_cast %68 : vector<1x1x5x128xf32> to vector<5x128xf32>
    %c55 = arith.constant 55 : index
    %c0_67 = arith.constant 0 : index
    %70 = vector.load %arg8[%c55, %c0_67] : memref<248x128xf32, #tpu.memory_space<vmem>>, vector<5x128xf32>
    tpu.vector_store %arg8[%c55, %c0_67], %69 {strides = array<i32>} : memref<248x128xf32, #tpu.memory_space<vmem>>, vector<5x128xf32>,
    %71 = vector.extract_strided_slice %69 {offsets = [0, 0], sizes = [4, 128], strides = [1, 1]} : vector<5x128xf32> to vector<4x128xf32>
    %72 = arith.mulf %71, %71 : vector<4x128xf32>
    %c179 = arith.constant 179 : index
    %c0_68 = arith.constant 0 : index
    %73 = vector.load %arg8[%c179, %c0_68] : memref<248x128xf32, #tpu.memory_space<vmem>>, vector<4x128xf32>
    tpu.vector_store %arg8[%c179, %c0_68], %72 {strides = array<i32>} : memref<248x128xf32, #tpu.memory_space<vmem>>, vector<4x128xf32>,
    %c0_69 = arith.constant 0 : index
    %c0_70 = arith.constant 0 : index
    %c0_71 = arith.constant 0 : index
    %c17 = arith.constant 17 : index
    %74 = vector.load %arg2[%c0_69, %c0_70, %c0_71, %c17] : memref<1x1x5x256xf32, #tpu.memory_space<vmem>>, vector<1x1x5x128xf32>
    %75 = vector.shape_cast %74 : vector<1x1x5x128xf32> to vector<5x128xf32>
    %c60 = arith.constant 60 : index
    %c0_72 = arith.constant 0 : index
    %76 = vector.load %arg8[%c60, %c0_72] : memref<248x128xf32, #tpu.memory_space<vmem>>, vector<5x128xf32>
    tpu.vector_store %arg8[%c60, %c0_72], %75 {strides = array<i32>} : memref<248x128xf32, #tpu.memory_space<vmem>>, vector<5x128xf32>,
    %77 = vector.extract_strided_slice %75 {offsets = [0, 0], sizes = [4, 128], strides = [1, 1]} : vector<5x128xf32> to vector<4x128xf32>
    %78 = arith.mulf %77, %77 : vector<4x128xf32>
    %c183 = arith.constant 183 : index
    %c0_73 = arith.constant 0 : index
    %79 = vector.load %arg8[%c183, %c0_73] : memref<248x128xf32, #tpu.memory_space<vmem>>, vector<4x128xf32>
    tpu.vector_store %arg8[%c183, %c0_73], %78 {strides = array<i32>} : memref<248x128xf32, #tpu.memory_space<vmem>>, vector<4x128xf32>,
    %c0_74 = arith.constant 0 : index
    %c0_75 = arith.constant 0 : index
    %c0_76 = arith.constant 0 : index
    %c17_77 = arith.constant 17 : index
    %80 = vector.load %arg3[%c0_74, %c0_75, %c0_76, %c17_77] : memref<1x1x5x256xf32, #tpu.memory_space<vmem>>, vector<1x1x5x128xf32>
    %81 = vector.shape_cast %80 : vector<1x1x5x128xf32> to vector<5x128xf32>
    %c65 = arith.constant 65 : index
    %c0_78 = arith.constant 0 : index
    %82 = vector.load %arg8[%c65, %c0_78] : memref<248x128xf32, #tpu.memory_space<vmem>>, vector<5x128xf32>
    tpu.vector_store %arg8[%c65, %c0_78], %81 {strides = array<i32>} : memref<248x128xf32, #tpu.memory_space<vmem>>, vector<5x128xf32>,
    %83 = vector.extract_strided_slice %81 {offsets = [0, 0], sizes = [4, 128], strides = [1, 1]} : vector<5x128xf32> to vector<4x128xf32>
    %84 = arith.mulf %83, %83 : vector<4x128xf32>
    %c187 = arith.constant 187 : index
    %c0_79 = arith.constant 0 : index
    %85 = vector.load %arg8[%c187, %c0_79] : memref<248x128xf32, #tpu.memory_space<vmem>>, vector<4x128xf32>
    tpu.vector_store %arg8[%c187, %c0_79], %84 {strides = array<i32>} : memref<248x128xf32, #tpu.memory_space<vmem>>, vector<4x128xf32>,
    %c0_80 = arith.constant 0 : index
    %c0_81 = arith.constant 0 : index
    %c0_82 = arith.constant 0 : index
    %c17_83 = arith.constant 17 : index
    %86 = vector.load %arg4[%c0_80, %c0_81, %c0_82, %c17_83] : memref<1x1x5x256xf32, #tpu.memory_space<vmem>>, vector<1x1x5x128xf32>
    %87 = vector.shape_cast %86 : vector<1x1x5x128xf32> to vector<5x128xf32>
    %c70 = arith.constant 70 : index
    %c0_84 = arith.constant 0 : index
    %88 = vector.load %arg8[%c70, %c0_84] : memref<248x128xf32, #tpu.memory_space<vmem>>, vector<5x128xf32>
    tpu.vector_store %arg8[%c70, %c0_84], %87 {strides = array<i32>} : memref<248x128xf32, #tpu.memory_space<vmem>>, vector<5x128xf32>,
    %89 = vector.extract_strided_slice %87 {offsets = [0, 0], sizes = [4, 128], strides = [1, 1]} : vector<5x128xf32> to vector<4x128xf32>
    %90 = arith.mulf %89, %89 : vector<4x128xf32>
    %c191 = arith.constant 191 : index
    %c0_85 = arith.constant 0 : index
    %91 = vector.load %arg8[%c191, %c0_85] : memref<248x128xf32, #tpu.memory_space<vmem>>, vector<4x128xf32>
    tpu.vector_store %arg8[%c191, %c0_85], %90 {strides = array<i32>} : memref<248x128xf32, #tpu.memory_space<vmem>>, vector<4x128xf32>,
    %c0_86 = arith.constant 0 : index
    %c0_87 = arith.constant 0 : index
    %c0_88 = arith.constant 0 : index
    %c16 = arith.constant 16 : index
    %92 = vector.load %arg2[%c0_86, %c0_87, %c0_88, %c16] : memref<1x1x5x256xf32, #tpu.memory_space<vmem>>, vector<1x1x5x128xf32>
    %93 = vector.shape_cast %92 : vector<1x1x5x128xf32> to vector<5x128xf32>
    %c75 = arith.constant 75 : index
    %c0_89 = arith.constant 0 : index
    %94 = vector.load %arg8[%c75, %c0_89] : memref<248x128xf32, #tpu.memory_space<vmem>>, vector<5x128xf32>
    tpu.vector_store %arg8[%c75, %c0_89], %93 {strides = array<i32>} : memref<248x128xf32, #tpu.memory_space<vmem>>, vector<5x128xf32>,
    %95 = vector.extract_strided_slice %93 {offsets = [0, 0], sizes = [4, 128], strides = [1, 1]} : vector<5x128xf32> to vector<4x128xf32>
    %96 = arith.mulf %95, %95 : vector<4x128xf32>
    %c195 = arith.constant 195 : index
    %c0_90 = arith.constant 0 : index
    %97 = vector.load %arg8[%c195, %c0_90] : memref<248x128xf32, #tpu.memory_space<vmem>>, vector<4x128xf32>
    tpu.vector_store %arg8[%c195, %c0_90], %96 {strides = array<i32>} : memref<248x128xf32, #tpu.memory_space<vmem>>, vector<4x128xf32>,
    %c0_91 = arith.constant 0 : index
    %c0_92 = arith.constant 0 : index
    %c0_93 = arith.constant 0 : index
    %c16_94 = arith.constant 16 : index
    %98 = vector.load %arg3[%c0_91, %c0_92, %c0_93, %c16_94] : memref<1x1x5x256xf32, #tpu.memory_space<vmem>>, vector<1x1x5x128xf32>
    %99 = vector.shape_cast %98 : vector<1x1x5x128xf32> to vector<5x128xf32>
    %c80 = arith.constant 80 : index
    %c0_95 = arith.constant 0 : index
    %100 = vector.load %arg8[%c80, %c0_95] : memref<248x128xf32, #tpu.memory_space<vmem>>, vector<5x128xf32>
    tpu.vector_store %arg8[%c80, %c0_95], %99 {strides = array<i32>} : memref<248x128xf32, #tpu.memory_space<vmem>>, vector<5x128xf32>,
    %101 = vector.extract_strided_slice %99 {offsets = [0, 0], sizes = [4, 128], strides = [1, 1]} : vector<5x128xf32> to vector<4x128xf32>
    %102 = arith.mulf %101, %101 : vector<4x128xf32>
    %c199 = arith.constant 199 : index
    %c0_96 = arith.constant 0 : index
    %103 = vector.load %arg8[%c199, %c0_96] : memref<248x128xf32, #tpu.memory_space<vmem>>, vector<4x128xf32>
    tpu.vector_store %arg8[%c199, %c0_96], %102 {strides = array<i32>} : memref<248x128xf32, #tpu.memory_space<vmem>>, vector<4x128xf32>,
    %c0_97 = arith.constant 0 : index
    %c0_98 = arith.constant 0 : index
    %c0_99 = arith.constant 0 : index
    %c16_100 = arith.constant 16 : index
    %104 = vector.load %arg4[%c0_97, %c0_98, %c0_99, %c16_100] : memref<1x1x5x256xf32, #tpu.memory_space<vmem>>, vector<1x1x5x128xf32>
    %105 = vector.shape_cast %104 : vector<1x1x5x128xf32> to vector<5x128xf32>
    %c85 = arith.constant 85 : index
    %c0_101 = arith.constant 0 : index
    %106 = vector.load %arg8[%c85, %c0_101] : memref<248x128xf32, #tpu.memory_space<vmem>>, vector<5x128xf32>
    tpu.vector_store %arg8[%c85, %c0_101], %105 {strides = array<i32>} : memref<248x128xf32, #tpu.memory_space<vmem>>, vector<5x128xf32>,
    %107 = vector.extract_strided_slice %105 {offsets = [0, 0], sizes = [4, 128], strides = [1, 1]} : vector<5x128xf32> to vector<4x128xf32>
    %108 = arith.mulf %107, %107 : vector<4x128xf32>
    %c203 = arith.constant 203 : index
    %c0_102 = arith.constant 0 : index
    %109 = vector.load %arg8[%c203, %c0_102] : memref<248x128xf32, #tpu.memory_space<vmem>>, vector<4x128xf32>
    tpu.vector_store %arg8[%c203, %c0_102], %108 {strides = array<i32>} : memref<248x128xf32, #tpu.memory_space<vmem>>, vector<4x128xf32>,
    %c0_103 = arith.constant 0 : index
    %c0_104 = arith.constant 0 : index
    %c0_105 = arith.constant 0 : index
    %c2 = arith.constant 2 : index
    %110 = vector.load %arg2[%c0_103, %c0_104, %c0_105, %c2] : memref<1x1x5x256xf32, #tpu.memory_space<vmem>>, vector<1x1x5x128xf32>
    %111 = vector.shape_cast %110 : vector<1x1x5x128xf32> to vector<5x128xf32>
    %c90 = arith.constant 90 : index
    %c0_106 = arith.constant 0 : index
    %112 = vector.load %arg8[%c90, %c0_106] : memref<248x128xf32, #tpu.memory_space<vmem>>, vector<5x128xf32>
    tpu.vector_store %arg8[%c90, %c0_106], %111 {strides = array<i32>} : memref<248x128xf32, #tpu.memory_space<vmem>>, vector<5x128xf32>,
    %113 = vector.extract_strided_slice %111 {offsets = [0, 0], sizes = [4, 128], strides = [1, 1]} : vector<5x128xf32> to vector<4x128xf32>
    %114 = arith.mulf %113, %113 : vector<4x128xf32>
    %c207 = arith.constant 207 : index
    %c0_107 = arith.constant 0 : index
    %115 = vector.load %arg8[%c207, %c0_107] : memref<248x128xf32, #tpu.memory_space<vmem>>, vector<4x128xf32>
    tpu.vector_store %arg8[%c207, %c0_107], %114 {strides = array<i32>} : memref<248x128xf32, #tpu.memory_space<vmem>>, vector<4x128xf32>,
    %c0_108 = arith.constant 0 : index
    %c0_109 = arith.constant 0 : index
    %c0_110 = arith.constant 0 : index
    %c2_111 = arith.constant 2 : index
    %116 = vector.load %arg3[%c0_108, %c0_109, %c0_110, %c2_111] : memref<1x1x5x256xf32, #tpu.memory_space<vmem>>, vector<1x1x5x128xf32>
    %117 = vector.shape_cast %116 : vector<1x1x5x128xf32> to vector<5x128xf32>
    %c95 = arith.constant 95 : index
    %c0_112 = arith.constant 0 : index
    %118 = vector.load %arg8[%c95, %c0_112] : memref<248x128xf32, #tpu.memory_space<vmem>>, vector<5x128xf32>
    tpu.vector_store %arg8[%c95, %c0_112], %117 {strides = array<i32>} : memref<248x128xf32, #tpu.memory_space<vmem>>, vector<5x128xf32>,
    %119 = vector.extract_strided_slice %117 {offsets = [0, 0], sizes = [4, 128], strides = [1, 1]} : vector<5x128xf32> to vector<4x128xf32>
    %120 = arith.mulf %119, %119 : vector<4x128xf32>
    %c211 = arith.constant 211 : index
    %c0_113 = arith.constant 0 : index
    %121 = vector.load %arg8[%c211, %c0_113] : memref<248x128xf32, #tpu.memory_space<vmem>>, vector<4x128xf32>
    tpu.vector_store %arg8[%c211, %c0_113], %120 {strides = array<i32>} : memref<248x128xf32, #tpu.memory_space<vmem>>, vector<4x128xf32>,
    %c0_114 = arith.constant 0 : index
    %c0_115 = arith.constant 0 : index
    %c0_116 = arith.constant 0 : index
    %c2_117 = arith.constant 2 : index
    %122 = vector.load %arg4[%c0_114, %c0_115, %c0_116, %c2_117] : memref<1x1x5x256xf32, #tpu.memory_space<vmem>>, vector<1x1x5x128xf32>
    %123 = vector.shape_cast %122 : vector<1x1x5x128xf32> to vector<5x128xf32>
    %c100 = arith.constant 100 : index
    %c0_118 = arith.constant 0 : index
    %124 = vector.load %arg8[%c100, %c0_118] : memref<248x128xf32, #tpu.memory_space<vmem>>, vector<5x128xf32>
    tpu.vector_store %arg8[%c100, %c0_118], %123 {strides = array<i32>} : memref<248x128xf32, #tpu.memory_space<vmem>>, vector<5x128xf32>,
    %125 = vector.extract_strided_slice %123 {offsets = [0, 0], sizes = [4, 128], strides = [1, 1]} : vector<5x128xf32> to vector<4x128xf32>
    %126 = arith.mulf %125, %125 : vector<4x128xf32>
    %c215 = arith.constant 215 : index
    %c0_119 = arith.constant 0 : index
    %127 = vector.load %arg8[%c215, %c0_119] : memref<248x128xf32, #tpu.memory_space<vmem>>, vector<4x128xf32>
    tpu.vector_store %arg8[%c215, %c0_119], %126 {strides = array<i32>} : memref<248x128xf32, #tpu.memory_space<vmem>>, vector<4x128xf32>,
    %c0_120 = arith.constant 0 : index
    %c0_121 = arith.constant 0 : index
    %c0_122 = arith.constant 0 : index
    %c1 = arith.constant 1 : index
    %128 = vector.load %arg2[%c0_120, %c0_121, %c0_122, %c1] : memref<1x1x5x256xf32, #tpu.memory_space<vmem>>, vector<1x1x5x128xf32>
    %129 = vector.shape_cast %128 : vector<1x1x5x128xf32> to vector<5x128xf32>
    %c105 = arith.constant 105 : index
    %c0_123 = arith.constant 0 : index
    %130 = vector.load %arg8[%c105, %c0_123] : memref<248x128xf32, #tpu.memory_space<vmem>>, vector<5x128xf32>
    tpu.vector_store %arg8[%c105, %c0_123], %129 {strides = array<i32>} : memref<248x128xf32, #tpu.memory_space<vmem>>, vector<5x128xf32>,
    %131 = vector.extract_strided_slice %129 {offsets = [0, 0], sizes = [4, 128], strides = [1, 1]} : vector<5x128xf32> to vector<4x128xf32>
    %132 = arith.mulf %131, %131 : vector<4x128xf32>
    %c219 = arith.constant 219 : index
    %c0_124 = arith.constant 0 : index
    %133 = vector.load %arg8[%c219, %c0_124] : memref<248x128xf32, #tpu.memory_space<vmem>>, vector<4x128xf32>
    tpu.vector_store %arg8[%c219, %c0_124], %132 {strides = array<i32>} : memref<248x128xf32, #tpu.memory_space<vmem>>, vector<4x128xf32>,
    %c0_125 = arith.constant 0 : index
    %c0_126 = arith.constant 0 : index
    %c0_127 = arith.constant 0 : index
    %c1_128 = arith.constant 1 : index
    %134 = vector.load %arg3[%c0_125, %c0_126, %c0_127, %c1_128] : memref<1x1x5x256xf32, #tpu.memory_space<vmem>>, vector<1x1x5x128xf32>
    %135 = vector.shape_cast %134 : vector<1x1x5x128xf32> to vector<5x128xf32>
    %c110 = arith.constant 110 : index
    %c0_129 = arith.constant 0 : index
    %136 = vector.load %arg8[%c110, %c0_129] : memref<248x128xf32, #tpu.memory_space<vmem>>, vector<5x128xf32>
    tpu.vector_store %arg8[%c110, %c0_129], %135 {strides = array<i32>} : memref<248x128xf32, #tpu.memory_space<vmem>>, vector<5x128xf32>,
    %137 = vector.extract_strided_slice %135 {offsets = [0, 0], sizes = [4, 128], strides = [1, 1]} : vector<5x128xf32> to vector<4x128xf32>
    %138 = arith.mulf %137, %137 : vector<4x128xf32>
    %c223 = arith.constant 223 : index
    %c0_130 = arith.constant 0 : index
    %139 = vector.load %arg8[%c223, %c0_130] : memref<248x128xf32, #tpu.memory_space<vmem>>, vector<4x128xf32>
    tpu.vector_store %arg8[%c223, %c0_130], %138 {strides = array<i32>} : memref<248x128xf32, #tpu.memory_space<vmem>>, vector<4x128xf32>,
    %c0_131 = arith.constant 0 : index
    %c0_132 = arith.constant 0 : index
    %c0_133 = arith.constant 0 : index
    %c1_134 = arith.constant 1 : index
    %140 = vector.load %arg4[%c0_131, %c0_132, %c0_133, %c1_134] : memref<1x1x5x256xf32, #tpu.memory_space<vmem>>, vector<1x1x5x128xf32>
    %141 = vector.shape_cast %140 : vector<1x1x5x128xf32> to vector<5x128xf32>
    %c115 = arith.constant 115 : index
    %c0_135 = arith.constant 0 : index
    %142 = vector.load %arg8[%c115, %c0_135] : memref<248x128xf32, #tpu.memory_space<vmem>>, vector<5x128xf32>
    tpu.vector_store %arg8[%c115, %c0_135], %141 {strides = array<i32>} : memref<248x128xf32, #tpu.memory_space<vmem>>, vector<5x128xf32>,
    %143 = vector.extract_strided_slice %141 {offsets = [0, 0], sizes = [4, 128], strides = [1, 1]} : vector<5x128xf32> to vector<4x128xf32>
    %144 = arith.mulf %143, %143 : vector<4x128xf32>
    %c227 = arith.constant 227 : index
    %c0_136 = arith.constant 0 : index
    %145 = vector.load %arg8[%c227, %c0_136] : memref<248x128xf32, #tpu.memory_space<vmem>>, vector<4x128xf32>
    tpu.vector_store %arg8[%c227, %c0_136], %144 {strides = array<i32>} : memref<248x128xf32, #tpu.memory_space<vmem>>, vector<4x128xf32>,
    %c0_137 = arith.constant 0 : index
    %c0_138 = arith.constant 0 : index
    %c0_139 = arith.constant 0 : index
    %c0_140 = arith.constant 0 : index
    %146 = vector.load %arg2[%c0_137, %c0_138, %c0_139, %c0_140] : memref<1x1x5x256xf32, #tpu.memory_space<vmem>>, vector<1x1x5x128xf32>
    %147 = vector.shape_cast %146 : vector<1x1x5x128xf32> to vector<5x128xf32>
    %c120 = arith.constant 120 : index
    %c0_141 = arith.constant 0 : index
    %148 = vector.load %arg8[%c120, %c0_141] : memref<248x128xf32, #tpu.memory_space<vmem>>, vector<5x128xf32>
    tpu.vector_store %arg8[%c120, %c0_141], %147 {strides = array<i32>} : memref<248x128xf32, #tpu.memory_space<vmem>>, vector<5x128xf32>,
    %149 = vector.extract_strided_slice %147 {offsets = [0, 0], sizes = [4, 128], strides = [1, 1]} : vector<5x128xf32> to vector<4x128xf32>
    %150 = arith.mulf %149, %149 : vector<4x128xf32>
    %c231 = arith.constant 231 : index
    %c0_142 = arith.constant 0 : index
    %151 = vector.load %arg8[%c231, %c0_142] : memref<248x128xf32, #tpu.memory_space<vmem>>, vector<4x128xf32>
    tpu.vector_store %arg8[%c231, %c0_142], %150 {strides = array<i32>} : memref<248x128xf32, #tpu.memory_space<vmem>>, vector<4x128xf32>,
    %c0_143 = arith.constant 0 : index
    %c0_144 = arith.constant 0 : index
    %c0_145 = arith.constant 0 : index
    %c0_146 = arith.constant 0 : index
    %152 = vector.load %arg3[%c0_143, %c0_144, %c0_145, %c0_146] : memref<1x1x5x256xf32, #tpu.memory_space<vmem>>, vector<1x1x5x128xf32>
    %153 = vector.shape_cast %152 : vector<1x1x5x128xf32> to vector<5x128xf32>
    %c125 = arith.constant 125 : index
    %c0_147 = arith.constant 0 : index
    %154 = vector.load %arg8[%c125, %c0_147] : memref<248x128xf32, #tpu.memory_space<vmem>>, vector<5x128xf32>
    tpu.vector_store %arg8[%c125, %c0_147], %153 {strides = array<i32>} : memref<248x128xf32, #tpu.memory_space<vmem>>, vector<5x128xf32>,
    %155 = vector.extract_strided_slice %153 {offsets = [0, 0], sizes = [4, 128], strides = [1, 1]} : vector<5x128xf32> to vector<4x128xf32>
    %156 = arith.mulf %155, %155 : vector<4x128xf32>
    %c235 = arith.constant 235 : index
    %c0_148 = arith.constant 0 : index
    %157 = vector.load %arg8[%c235, %c0_148] : memref<248x128xf32, #tpu.memory_space<vmem>>, vector<4x128xf32>
    tpu.vector_store %arg8[%c235, %c0_148], %156 {strides = array<i32>} : memref<248x128xf32, #tpu.memory_space<vmem>>, vector<4x128xf32>,
    %c0_149 = arith.constant 0 : index
    %c0_150 = arith.constant 0 : index
    %c0_151 = arith.constant 0 : index
    %c0_152 = arith.constant 0 : index
    %158 = vector.load %arg4[%c0_149, %c0_150, %c0_151, %c0_152] : memref<1x1x5x256xf32, #tpu.memory_space<vmem>>, vector<1x1x5x128xf32>
    %159 = vector.shape_cast %158 : vector<1x1x5x128xf32> to vector<5x128xf32>
    %c130 = arith.constant 130 : index
    %c0_153 = arith.constant 0 : index
    %160 = vector.load %arg8[%c130, %c0_153] : memref<248x128xf32, #tpu.memory_space<vmem>>, vector<5x128xf32>
    tpu.vector_store %arg8[%c130, %c0_153], %159 {strides = array<i32>} : memref<248x128xf32, #tpu.memory_space<vmem>>, vector<5x128xf32>,
    %161 = vector.extract_strided_slice %159 {offsets = [0, 0], sizes = [4, 128], strides = [1, 1]} : vector<5x128xf32> to vector<4x128xf32>
    %162 = arith.mulf %161, %161 : vector<4x128xf32>
    %c239 = arith.constant 239 : index
    %c0_154 = arith.constant 0 : index
    %163 = vector.load %arg8[%c239, %c0_154] : memref<248x128xf32, #tpu.memory_space<vmem>>, vector<4x128xf32>
    tpu.vector_store %arg8[%c239, %c0_154], %162 {strides = array<i32>} : memref<248x128xf32, #tpu.memory_space<vmem>>, vector<4x128xf32>,
    %c0_155 = arith.constant 0 : index
    %c0_156 = arith.constant 0 : index
    %164 = vector.load %arg5[%c0_155, %c0_156] : memref<32x248xf32, #tpu.memory_space<vmem>>, vector<32x248xf32>
    %c0_157 = arith.constant 0 : index
    %c0_158 = arith.constant 0 : index
    %165 = vector.load %arg8[%c0_157, %c0_158] : memref<248x128xf32, #tpu.memory_space<vmem>>, vector<248x128xf32>
    %cst_159 = arith.constant dense<0.000000e+00> : vector<32x128xf32>
    %166 = tpu.matmul %164, %165, %cst_159 {dimension_numbers = #tpu.dot_dimension_numbers<[1], [0], [0], [1], [0, 0, 1, 1], [], []>} : vector<32x248xf32>, vector<248x128xf32>, vector<32x128xf32> -> vector<32x128xf32>
    %167 = vector.extract_strided_slice %166 {offsets = [0, 0], sizes = [8, 128], strides = [1, 1]} : vector<32x128xf32> to vector<8x128xf32>
    %168 = vector.extract_strided_slice %166 {offsets = [8, 0], sizes = [8, 128], strides = [1, 1]} : vector<32x128xf32> to vector<8x128xf32>
    %169 = vector.extract_strided_slice %166 {offsets = [16, 0], sizes = [8, 128], strides = [1, 1]} : vector<32x128xf32> to vector<8x128xf32>
    %170 = vector.extract_strided_slice %166 {offsets = [24, 0], sizes = [1, 128], strides = [1, 1]} : vector<32x128xf32> to vector<1x128xf32>
    %171 = vector.extract_strided_slice %166 {offsets = [25, 0], sizes = [1, 128], strides = [1, 1]} : vector<32x128xf32> to vector<1x128xf32>
    %172 = vector.extract_strided_slice %166 {offsets = [26, 0], sizes = [1, 128], strides = [1, 1]} : vector<32x128xf32> to vector<1x128xf32>
    %cst_160 = arith.constant 4.000000e+00 : f32
    %173 = vector.broadcast %cst_160 : f32 to vector<1x128xf32>
    %174 = arith.mulf %173, %171 : vector<1x128xf32>
    %cst_161 = arith.constant 1.000000e+00 : f32
    %175 = vector.broadcast %cst_161 : f32 to vector<1x128xf32>
    %176 = arith.maximumf %174, %175 : vector<1x128xf32>
    %177 = tpu.reciprocal %176 : vector<1x128xf32> -> vector<1x128xf32>
    %178 = arith.mulf %170, %177 : vector<1x128xf32>
    %179 = arith.mulf %172, %177 : vector<1x128xf32>
    %180 = arith.mulf %178, %178 : vector<1x128xf32>
    %181 = arith.subf %179, %180 : vector<1x128xf32>
    %cst_162 = arith.constant 0.000000e+00 : f32
    %182 = vector.broadcast %cst_162 : f32 to vector<1x128xf32>
    %183 = arith.maximumf %181, %182 : vector<1x128xf32>
    %cst_163 = arith.constant 9.99999974E-6 : f32
    %184 = vector.broadcast %cst_163 : f32 to vector<1x128xf32>
    %185 = arith.addf %183, %184 : vector<1x128xf32>
    %cst_164 = arith.constant 2.000000e+00 : f32
    %186 = vector.broadcast %cst_164 : f32 to vector<1x128xf32>
    %187 = arith.maximumf %174, %186 : vector<1x128xf32>
    %188 = arith.mulf %185, %187 : vector<1x128xf32>
    %cst_165 = arith.constant 1.000000e+00 : f32
    %189 = vector.broadcast %cst_165 : f32 to vector<1x128xf32>
    %190 = arith.subf %187, %189 : vector<1x128xf32>
    %191 = tpu.reciprocal %190 : vector<1x128xf32> -> vector<1x128xf32>
    %192 = arith.mulf %188, %191 : vector<1x128xf32>
    %193 = math.rsqrt %192 : vector<1x128xf32>
    %194 = vector.broadcast %178 : vector<1x128xf32> to vector<8x128xf32>
    %195 = arith.mulf %194, %168 : vector<8x128xf32>
    %196 = arith.subf %167, %195 : vector<8x128xf32>
    %197 = vector.broadcast %193 : vector<1x128xf32> to vector<8x128xf32>
    %198 = arith.mulf %196, %197 : vector<8x128xf32>
    %199 = arith.addf %198, %169 : vector<8x128xf32>
    %c0_166 = arith.constant 0 : index
    %c0_167 = arith.constant 0 : index
    %200 = vector.load %arg6[%c0_166, %c0_167] : memref<8x1xf32, #tpu.memory_space<vmem>>, vector<8x1xf32>
    %201 = vector.broadcast %200 : vector<8x1xf32> to vector<8x128xf32>
    %202 = arith.addf %199, %201 : vector<8x128xf32>
    %c0_168 = arith.constant 0 : index
    %c0_169 = arith.constant 0 : index
    %c0_170 = arith.constant 0 : index
    %c0_171 = arith.constant 0 : index
    %203 = vector.load %arg7[%c0_168, %c0_169, %c0_170, %c0_171] : memref<1x1x8x128xf32, #tpu.memory_space<vmem>>, vector<1x1x8x128xf32>
    %204 = vector.shape_cast %203 : vector<1x1x8x128xf32> to vector<8x128xf32>
    %205 = vector.shape_cast %202 : vector<8x128xf32> to vector<1x1x8x128xf32>
    tpu.vector_store %arg7[%c0_168, %c0_169, %c0_170, %c0_171], %205 {strides = array<i32>} : memref<1x1x8x128xf32, #tpu.memory_space<vmem>>, vector<1x1x8x128xf32>,
    return
  }
  func.func @transform_0(%arg0: i32, %arg1: i32) -> (i32, i32, i32, i32) {
    %c0_i32 = arith.constant 0 : i32
    %0 = arith.addi %arg1, %c0_i32 : i32
    %c0_i32_0 = arith.constant 0 : i32
    %c0_i32_1 = arith.constant 0 : i32
    %c0_i32_2 = arith.constant 0 : i32
    return %arg0, %0, %c0_i32_0, %c0_i32_1 : i32, i32, i32, i32
  }
  func.func @transform_1(%arg0: i32, %arg1: i32) -> (i32, i32, i32, i32) {
    %c1_i32 = arith.constant 1 : i32
    %0 = arith.addi %arg1, %c1_i32 : i32
    %c0_i32 = arith.constant 0 : i32
    %c0_i32_0 = arith.constant 0 : i32
    %c0_i32_1 = arith.constant 0 : i32
    return %arg0, %0, %c0_i32, %c0_i32_0 : i32, i32, i32, i32
  }
  func.func @transform_2(%arg0: i32, %arg1: i32) -> (i32, i32, i32, i32) {
    %c2_i32 = arith.constant 2 : i32
    %0 = arith.addi %arg1, %c2_i32 : i32
    %c0_i32 = arith.constant 0 : i32
    %c0_i32_0 = arith.constant 0 : i32
    %c0_i32_1 = arith.constant 0 : i32
    return %arg0, %0, %c0_i32, %c0_i32_0 : i32, i32, i32, i32
  }
  func.func @transform_3(%arg0: i32, %arg1: i32) -> (i32, i32) {
    %c0_i32 = arith.constant 0 : i32
    %c0_i32_0 = arith.constant 0 : i32
    %c0_i32_1 = arith.constant 0 : i32
    return %c0_i32, %c0_i32_0 : i32, i32
  }
  func.func @transform_4(%arg0: i32, %arg1: i32) -> (i32, i32) {
    %c0_i32 = arith.constant 0 : i32
    %c0_i32_0 = arith.constant 0 : i32
    %c0_i32_1 = arith.constant 0 : i32
    return %c0_i32, %c0_i32_0 : i32, i32
  }
  func.func @transform_5(%arg0: i32, %arg1: i32) -> (i32, i32, i32, i32) {
    %c0_i32 = arith.constant 0 : i32
    %c0_i32_0 = arith.constant 0 : i32
    %c0_i32_1 = arith.constant 0 : i32
    return %arg0, %arg1, %c0_i32, %c0_i32_0 : i32, i32, i32, i32
  }
}

</mosaic_0001>

<bundles_post_ra>
// kernel: tpu_custom_call.1
= control target key start
LH: loop header
LB: loop body
LE: loop exit
PB: predicated region body
PF: predicated region fallthrough
CT: control target
= control target key end

     0   :  { %10 = vsyncpa [#allocation4], 0  ;;  %s2192_s0 = inlined_call_operand.vmem [shape: f32[2,10,5,256], index: 0, kind: input, shape index: {}]   ;;  %s2193_s1 = inlined_call_operand.vmem [shape: f32[2,10,5,256], index: 1, kind: input, shape index: {}]   ;;  %s2194_s2 = inlined_call_operand.vmem [shape: f32[2,10,5,256], index: 2, kind: input, shape index: {}]   ;;  %s2195_s3 = inlined_call_operand.vmem [shape: f32[32,248], index: 3, kind: input, shape index: {}]   ;;  %s2196_s4 = inlined_call_operand.vmem [shape: f32[8,1], index: 4, kind: input, shape index: {}]   ;;  %s2197_s5 = inlined_call_operand.hbm [shape: f32[2,8,8,128], index: 5, kind: output, shape index: {}]  }
   0x1   :  { %12 = vsyncpa [#allocation4 + $0x1], 0  ;;  %s1515_s18 = smov 0   ;;  %s1517_s19 = smov 0  }
   0x2   :  { %s1519_s20 = smov 0   ;;  %s1521_s21 = smov 0  }
   0x3   :  { %s1523_s22 = smov 0   ;;  %s1525_s23 = smov 0  }
   0x4   :  { %s1527_s24 = smov 0   ;;  %s1529_s25 = smov 0  }
   0x5 LB: > { %s1207_s26 = sadd.s32 4294967295, %s1472_s25   ;;  %s1208_s27 = sadd.s32 4294967294, %s1472_s25   ;;  %s1472_s25 = sphi %s1529_s25, %s18_s25   ;;  %s1468_s24 = sphi %s1527_s24, %s2209_s24   ;;  %s1464_s23 = sphi %s1525_s23, %s2208_s23   ;;  %s1460_s22 = sphi %s1523_s22, %s2207_s22   ;;  %s1456_s21 = sphi %s1521_s21, %s2206_s21   ;;  %s1452_s20 = sphi %s1519_s20, %s2205_s20   ;;  %s1448_s19 = sphi %s1517_s19, %s2204_s19   ;;  %s1444_s18 = sphi %s1515_s18, %s2203_s18  }
   0x6   : > { %s27_s28 = sadd.s32 1, %s1464_s23  ;;  %s30_s29 = sadd.s32 1, %s1468_s24 }
   0x7   : > { %p28_p0 = scmp.ge.s32.totalorder %s27_s28, 8  ;;  %p179_p1 = scmp.ne.s32.totalorder %s1452_s20, %s1448_s19 }
   0x8   : > { %p180_p2 = scmp.eq.s32.totalorder %s1207_s26, 15  ;;  %p185_p5 = scmp.ne.s32.totalorder %s1448_s19, %s1444_s18 }
   0x9   : > { %s2211_s28 = smov (%p28_p0, %s27_s28), 0  ;;  %s2213_s29 = smov (!%p28_p0, %s30_s29), %s1468_s24 }
   0xa   : > { %s165_s30 = ssub.s32 %s1464_s23, %s2211_s28  ;;  %p1566_p3 = por %p180_p2, %p179_p1 }
   0xb   : > { %p32_p4 = scmp.ge.s32.totalorder %s2213_s29, 2  ;;  %p186_p6 = scmp.eq.s32.totalorder %s1208_s27, 15 }
   0xc   : > { %p1211_p7 = scmp.ge.s32.totalorder %s1472_s25, 1  ;;  %p250_p9 = scmp.lt.s32.totalorder %s1472_s25, 17 }
   0xd   : > { %s2215_s29 = smov (%p32_p4, %s2213_s29), 0  ;;  %p1575_p8 = por %p186_p6, %p185_p5 }
   0xe   : > { %s164_s8 = ssub.s32 %s1468_s24, %s2215_s29  ;;  %s169_s9 = sadd.s32 1, %s1452_s20 }
   0xf   : > { %s166_s10 = sor.u32 %s165_s30, %s164_s8  ;;  %p251_p10 = pnand %p1211_p7, %p250_p9 }
  0x10   : > { %p167_p11 = scmp.eq.s32.totalorder %s166_s10, 0  ;;  %p302_p12 = scmp.lt.s32.totalorder (!%p251_p10), %s1460_s22, 1 }
  0x11   : > { %254 = sbr.rel (%p251_p10) target bundleno = 616 (0x268), region = 40  ;;  %s322_s12 = sadd.s32 (!%p251_p10), 2, %s1456_s21 }
  0x12   : > { %s1584_s11 = scalar_select %p167_p11, %s1452_s20, %s169_s9  }
  0x13   : > { %p325_p13 = scmp.lt.s32.totalorder (!%p251_p10), %s322_s12, 9  ;;  %s311_s15 = sadd.s32 (!%p251_p10), 1, %s1456_s21 }
  0x14   : > { %p314_p0 = scmp.lt.s32.totalorder (!%p251_p10), %s311_s15, 9  ;;  %p304_p1 = scmp.lt.s32.totalorder (!%p251_p10), %s1456_s21, 9 }
  0x15   : > { %s2198_s9 = smov (!%p251_p10), 127   ;;  %s1480_s30 = smov (!%p251_p10), 96  }
  0x16   : > { %s303_s13 = scalar_select %p302_p12, %s1460_s22, 1  ;;  %v1475_v2 = vmov 0.0   ;;  %vm811_vm0 = vcmask 1039360   ;;  %vm744_vm1 = vcmask 1031168   ;;  %vm677_vm2 = vcmask 916480  }
  0x17   : > { %s2217_s12 = smov (!%p325_p13, %s322_s12), 9  ;;  %s2219_s15 = smov (!%p314_p0, %s311_s15), 9  ;;  %934 = vmatprep.subr.mxu0 %v1475_v2  ;;  %333 = vst [vmem:[#allocation2 + $0xf3] sm:$0x1f] %v1475_v2  ;;  %1229 = vmatprep.subr.mxu1 %v1475_v2  ;;  %vm610_vm3 = vcmask 908288   ;;  %vm543_vm4 = vcmask 900096  }
  0x18   : > { %s1291_s14 = smul.u32 20, %s303_s13  ;;  %s1217_s16 = sshll.u32 %s2217_s12, 1  ;;  %vm476_vm5 = vcmask 785408   ;;  %vm409_vm6 = vcmask 777216   ;;  %vm921_vm7 = vcmask 982016   ;;  %vm342_vm8 = vcmask 769024  }
  0x19   : > { %s305_s10 = scalar_select %p304_p1, %s1456_s21, 9 }
  0x1a   : > { %s329_s17 = sadd.s32 %s1291_s14, %s1217_s16  ;;  %s1215_s12 = sshll.u32 %s2219_s15, 1 }
  0x1b   : > { %s1218_s26 = sshll.u32 %s329_s17, 3  ;;  %s318_s13 = sadd.s32 %s1291_s14, %s1215_s12 }
  0x1c   : > { %s1594_s8 = scalar_lea.vmem %s2194_s2, %s1218_s26  ;;  %s1213_s16 = sshll.u32 %s305_s10, 1 }
  0x1d   : > { %v1597_v0 = vld [vmem:[%s1594_s8] sm:$0x1f]  ;;  %v1603_v1 = vld [vmem:[%s1594_s8 + $0x8] sm:$0x1f]  ;;  %s1216_s17 = sshll.u32 %s318_s13, 3  ;;  %s308_s27 = sadd.s32 %s1291_s14, %s1213_s16 }
  0x1e   : > { %852 = vrot.lane.b32.xlu1 %v1597_v0, %s2198_s9  ;;  %s1611_s9 = scalar_lea.vmem %s2193_s1, %s1216_s17  ;;  %s2202_s15 = smov 127   ;;  %v1619_v4 = vld [vmem:[%s1594_s8 + $0x8] sm:$0x1f]  ;;  %v1639_v7 = vld [vmem:[%s1594_s8] sm:$0x1f]  ;;  %v860_v57 = vmul.f32 %v1603_v1, %v1603_v1  ;;  %v859_v60 = vmul.f32 %v1597_v0, %v1597_v0 }
  0x1f   : > { %s1214_s14 = sshll.u32 %s308_s27, 3  ;;  %v1616_v3 = vld [vmem:[%s1611_s9] sm:$0x1f]  ;;  %v1629_v5 = vld [vmem:[%s1611_s9 + $0x8] sm:$0x1f]  ;;  %s1476_s16 = smov 126   ;;  %v793_v59 = vmul.f32 %v1619_v4, %v1619_v4  ;;  %v792_v62 = vmul.f32 %v1639_v7, %v1639_v7 }
  0x20   : > { %830 = vrot.lane.b32.xlu0 %v1616_v3, %s2202_s15  ;;  %s1626_s13 = scalar_lea.vmem %s2192_s0, %s1214_s14  ;;  %v1644_v8 = vld [vmem:[%s1611_s9 + $0x8] sm:$0x1f]  ;;  %v1663_v12 = vld [vmem:[%s1611_s9] sm:$0x1f]  ;;  %s1477_s17 = smov 112   ;;  %v838_v55 = vmul.f32 %v1629_v5, %v1629_v5  ;;  %v837_v58 = vmul.f32 %v1616_v3, %v1616_v3 }
  0x21   : > { %v1634_v6 = vld [vmem:[%s1626_s13 + $0x8] sm:$0x1f]  ;;  %v1649_v9 = vld [vmem:[%s1626_s13] sm:$0x1f]  ;;  %875 = vst [vmem:[#allocation2 + $0x7d] sm:$0x1f] %v1663_v12  ;;  %v876_v54 = vmul.f32 %v1663_v12, %v1663_v12 }
  0x22   : > { %854 = vrot.lane.b32.xlu1 %v1603_v1, %s2202_s15  ;;  %v1654_v10 = vld [vmem:[%s1594_s8 + $0x8] sm:$0x1f]  ;;  %v1657_v11 = vld [vmem:[%s1626_s13] sm:$0x1f]  ;;  %s1478_s27 = smov 111   ;;  %s1479_s26 = smov 110   ;;  %v816_v61 = vmul.f32 %v1634_v6, %v1634_v6  ;;  %v815_v0 = vmul.f32 %v1649_v9, %v1649_v9  ;;  %v771_v1 = vmul.f32 %v1644_v8, %v1644_v8 }
  0x23   : > { %871 = vst [vmem:[#allocation2 + $0x78] sm:$0x1f] %v1657_v11  ;;  %v1666_v13 = vld [vmem:[%s1611_s9] sm:$0x1f]  ;;  %v1672_v14 = vld [vmem:[%s1626_s13 + $0x8] sm:$0x1f]  ;;  %v872_v53 = vmul.f32 %v1657_v11, %v1657_v11 }
  0x24   : > { %832 = vrot.lane.b32.xlu0 %v1629_v5, %s2202_s15  ;;  %v1677_v15 = vld [vmem:[%s1594_s8] sm:$0x1f]  ;;  %v1682_v16 = vld [vmem:[%s1611_s9 + $0x8] sm:$0x1f]  ;;  %s1481_s14 = smov 95   ;;  %s1482_s10 = smov 94   ;;  %v749_v63 = vmul.f32 %v1672_v14, %v1672_v14 }
  0x25   : > { %v1687_v18 = vld [vmem:[%s1626_s13] sm:$0x1f]  ;;  %v1693_v19 = vld [vmem:[%s1594_s8 + $0x8] sm:$0x1f]  ;;  %873 = vst [vmem:[#allocation2 + $0xe7] sm:$0xf] %v872_v53  ;;  %v704_v5 = vmul.f32 %v1682_v16, %v1682_v16 }
  0x26   : > { %787 = vrot.lane.b32.xlu1 %v1619_v4, %s1476_s16  ;;  %v1699_v20 = vld [vmem:[%s1611_s9] sm:$0x1f]  ;;  %v1704_v21 = vld [vmem:[%s1626_s13 + $0x8] sm:$0x1f]  ;;  %877 = vst [vmem:[#allocation2 + $0xeb] sm:$0xf] %v876_v54  ;;  %v748_v3 = vmul.f32 %v1687_v18, %v1687_v18 }
  0x27   : > { %v1709_v22 = vld [vmem:[%s1594_s8] sm:$0x1f]  ;;  %v1714_v23 = vld [vmem:[%s1626_s13 + $0x8] sm:$0x1f]  ;;  %v703_v12 = vmul.f32 %v1699_v20, %v1699_v20 }
  0x28   : > { %785 = vrot.lane.b32.xlu0 %v1639_v7, %s1476_s16  ;;  %v1719_v24 = vld [vmem:[%s1626_s13] sm:$0x1f]  ;;  %v1724_v25 = vld [vmem:[%s1611_s9 + $0x8] sm:$0x1f]  ;;  %v615_v53 = vmul.f32 %v1714_v23, %v1714_v23 }
  0x29   : > { %v1729_v26 = vld [vmem:[%s1626_s13] sm:$0x1f]  ;;  %v1734_v27 = vld [vmem:[%s1594_s8 + $0x8] sm:$0x1f] }
  0x2a   : > { %809 = vrot.lane.b32.xlu1 %v1634_v6, %s2202_s15  ;;  %v905_v17 = vld [vmem:[#allocation2 + $0x78] sm:$0xff]  ;;  %v1739_v28 = vld [vmem:[%s1611_s9] sm:$0x1f]  ;;  %v1744_v29 = vld [vmem:[%s1626_s13 + $0x8] sm:$0x1f]  ;;  %v770_v6 = vmul.f32 %v1666_v13, %v1666_v13 }
  0x2b   : > { %935 = vmatpush1.msra.mxu0 %v905_v17  ;;  %1260 = vmatpush1.msra.mxu1 %v905_v17  ;;  %v1749_v30 = vld [vmem:[%s1594_s8] sm:$0x1f]  ;;  %v1754_v31 = vld [vmem:[%s1611_s9 + $0x8] sm:$0x1f] }
  0x2c   : > { %807 = vrot.lane.b32.xlu0 %v1649_v9, %s2202_s15  ;;  %936 = vmatprep.subr.mxu0 %v1475_v2  ;;  %v1759_v32 = vld [vmem:[%s1626_s13] sm:$0x1f]  ;;  %v1764_v33 = vld [vmem:[%s1594_s8 + $0x8] sm:$0x1f]  ;;  %v726_v9 = vmul.f32 %v1654_v10, %v1654_v10 }
  0x2d   : > { %1230 = vmatprep.subr.mxu1 %v1475_v2  ;;  %v1769_v34 = vld [vmem:[%s1611_s9] sm:$0x1f]  ;;  %v1774_v35 = vld [vmem:[%s1626_s13 + $0x8] sm:$0x1f] }
  0x2e   : > { %765 = vrot.lane.b32.xlu1 %v1644_v8, %s1476_s16  ;;  %v1779_v36 = vld [vmem:[%s1594_s8] sm:$0x1f]  ;;  %v1784_v37 = vld [vmem:[%s1611_s9 + $0x8] sm:$0x1f] }
  0x2f   : > { %v1789_v38 = vld [vmem:[%s1626_s13] sm:$0x1f]  ;;  %v1794_v39 = vld [vmem:[%s1611_s9 + $0x8] sm:$0x1f] }
  0x30   : > { %763 = vrot.lane.b32.xlu0 %v1666_v13, %s1476_s16  ;;  %v1799_v40 = vld [vmem:[%s1611_s9] sm:$0x1f]  ;;  %v1804_v41 = vld [vmem:[%s1594_s8 + $0x8] sm:$0x1f]  ;;  %v659_v13 = vmul.f32 %v1693_v19, %v1693_v19 }
  0x31   : > { %v1809_v42 = vld [vmem:[%s1611_s9] sm:$0x1f]  ;;  %v1814_v43 = vld [vmem:[%s1626_s13 + $0x8] sm:$0x1f] }
  0x32   : > { %720 = vrot.lane.b32.xlu1 %v1654_v10, %s1477_s17  ;;  %v1819_v44 = vld [vmem:[%s1594_s8] sm:$0x1f]  ;;  %v1824_v45 = vld [vmem:[%s1611_s9 + $0x8] sm:$0x1f]  ;;  %v725_v10 = vmul.f32 %v1677_v15, %v1677_v15 }
  0x33   : > { %v1829_v46 = vld [vmem:[%s1626_s13] sm:$0x1f]  ;;  %v1834_v47 = vld [vmem:[%s1594_s8 + $0x8] sm:$0x1f] }
  0x34   : > { %718 = vrot.lane.b32.xlu0 %v1677_v15, %s1477_s17  ;;  %v1839_v48 = vld [vmem:[%s1611_s9] sm:$0x1f]  ;;  %v1845_v50 = vld [vmem:[%s1626_s13 + $0x8] sm:$0x1f]  ;;  %v658_v15 = vmul.f32 %v1709_v22, %v1709_v22 }
  0x35   : > { %v878_v49 = vld [vmem:[%s1594_s8] sm:$0x1f] }
  0x36   : > { %742 = vrot.lane.b32.xlu1 %v1672_v14, %s1476_s16  ;;  %v880_v51 = vmul.f32 %v878_v49, %v878_v49  ;;  %879 = vst [vmem:[#allocation2 + $0x82] sm:$0x1f] %v878_v49  ;;  %v1850_v52 = vld [vmem:[%s1594_s8] sm:$0x1f] }
  0x37   : > { %v1863_v56 = vld [vmem:[%s1626_s13] sm:$0x1f] }
  0x38   : > { %740 = vrot.lane.b32.xlu0 %v1687_v18, %s1476_s16  ;;  %881 = vst [vmem:[#allocation2 + $0xef] sm:$0xf] %v880_v51 }
  0x3a   : > { %698 = vrot.lane.b32.xlu1 %v1682_v16, %s1477_s17 }
  0x3c   : > { %696 = vrot.lane.b32.xlu0 %v1699_v20, %s1477_s17  ;;  %v682_v20 = vmul.f32 %v1704_v21, %v1704_v21 }
  0x3e   : > { %653 = vrot.lane.b32.xlu1 %v1693_v19, %s1478_s27 }
  0x40   : > { %651 = vrot.lane.b32.xlu0 %v1709_v22, %s1478_s27  ;;  %v637_v22 = vmul.f32 %v1724_v25, %v1724_v25 }
  0x42   : > { %675 = vrot.lane.b32.xlu1 %v1704_v21, %s1477_s17 }
  0x44   : > { %673 = vrot.lane.b32.xlu0 %v1719_v24, %s1477_s17 }
  0x46   : > { %608 = vrot.lane.b32.xlu1 %v1714_v23, %s1478_s27 }
  0x48   : > { %606 = vrot.lane.b32.xlu0 %v1729_v26, %s1478_s27 }
  0x4a   : > { %631 = vrot.lane.b32.xlu1 %v1724_v25, %s1478_s27 }
  0x4c   : > { %629 = vrot.lane.b32.xlu0 %v1739_v28, %s1478_s27 }
  0x4e   : > { %586 = vrot.lane.b32.xlu1 %v1734_v27, %s1479_s26 }
  0x50   : > { %584 = vrot.lane.b32.xlu0 %v1749_v30, %s1479_s26 }
  0x52   : > { %541 = vrot.lane.b32.xlu1 %v1744_v29, %s1479_s26 }
  0x54   : > { %539 = vrot.lane.b32.xlu0 %v1759_v32, %s1479_s26 }
  0x56   : > { %564 = vrot.lane.b32.xlu1 %v1754_v31, %s1479_s26 }
  0x58   : > { %562 = vrot.lane.b32.xlu0 %v1769_v34, %s1479_s26 }
  0x5a   : > { %519 = vrot.lane.b32.xlu1 %v1764_v33, %s1480_s30 }
  0x5c   : > { %517 = vrot.lane.b32.xlu0 %v1779_v36, %s1480_s30 }
  0x5e   : > { %474 = vrot.lane.b32.xlu1 %v1774_v35, %s1480_s30 }
  0x60   : > { %472 = vrot.lane.b32.xlu0 %v1789_v38, %s1480_s30 }
  0x62   : > { %497 = vrot.lane.b32.xlu1 %v1784_v37, %s1480_s30 }
  0x64   : > { %495 = vrot.lane.b32.xlu0 %v1799_v40, %s1480_s30 }
  0x66   : > { %430 = vrot.lane.b32.xlu1 %v1794_v39, %s1481_s14 }
  0x68   : > { %428 = vrot.lane.b32.xlu0 %v1809_v42, %s1481_s14 }
  0x6a   : > { %452 = vrot.lane.b32.xlu1 %v1804_v41, %s1481_s14 }
  0x6c   : > { %450 = vrot.lane.b32.xlu0 %v1819_v44, %s1481_s14 }
  0x6e   : > { %407 = vrot.lane.b32.xlu1 %v1814_v43, %s1481_s14 }
  0x70   : > { %405 = vrot.lane.b32.xlu0 %v1829_v46, %s1481_s14 }
  0x72   : > { %363 = vrot.lane.b32.xlu1 %v1824_v45, %s1482_s10 }
  0x74   : > { %361 = vrot.lane.b32.xlu0 %v1839_v48, %s1482_s10 }
  0x76   : > { %385 = vrot.lane.b32.xlu1 %v1834_v47, %s1482_s10 }
  0x78   : > { %383 = vrot.lane.b32.xlu0 %v1850_v52, %s1482_s10 }
  0x7a   : > { %340 = vrot.lane.b32.xlu1 %v1845_v50, %s1482_s10 }
  0x7c   : > { %338 = vrot.lane.b32.xlu0 %v1863_v56, %s1482_s10 }
  0x7e   : > { %843 = vrot.lane.b32.xlu1 %v838_v55, %s2202_s15 }
  0x80   : > { %841 = vrot.lane.b32.xlu0 %v837_v58, %s2202_s15  ;;  %v681_v58 = vmul.f32 %v1719_v24, %v1719_v24  ;;  %v614_v24 = vmul.f32 %v1729_v26, %v1729_v26  ;;  %v592_v26 = vmul.f32 %v1734_v27, %v1734_v27  ;;  %v525_v27 = vmul.f32 %v1764_v33, %v1764_v33 }
  0x82   : > { %865 = vrot.lane.b32.xlu1 %v860_v57, %s2202_s15 }
  0x84   : > { %863 = vrot.lane.b32.xlu0 %v859_v60, %s2202_s15 }
  0x86   : > { %798 = vrot.lane.b32.xlu1 %v793_v59, %s1476_s16 }
  0x88   : > { %796 = vrot.lane.b32.xlu0 %v792_v62, %s1476_s16 }
  0x8a   : > { %821 = vrot.lane.b32.xlu1 %v816_v61, %s2202_s15  ;;  %v570_v61 = vmul.f32 %v1754_v31, %v1754_v31 }
  0x8c   : > { %819 = vrot.lane.b32.xlu0 %v815_v0, %s2202_s15 }
  0x8e   : > { %754 = vrot.lane.b32.xlu1 %v749_v63, %s1476_s16 }
  0x90   : > { %v853_v4 = vpop.permute.xlu1 %852  ;;  %752 = vrot.lane.b32.xlu0 %v748_v3, %s1476_s16 }
  0x92   : > { %776 = vrot.lane.b32.xlu1 %v771_v1, %s1476_s16  ;;  %v831_v11 = vpop.permute.xlu0 %830  ;;  %v636_v1 = vmul.f32 %v1739_v28, %v1739_v28  ;;  %v569_v28 = vmul.f32 %v1769_v34, %v1769_v34  ;;  %v591_v34 = vmul.f32 %v1749_v30, %v1749_v30 }
  0x94   : > { %v855_v7 = vpop.permute.xlu1 %854  ;;  %774 = vrot.lane.b32.xlu0 %v770_v6, %s1476_s16 }
  0x95   : > { %v856_v8 = vsel %vm811_vm0, %v853_v4, %v855_v7 }
  0x96   : > { %858 = vst [vmem:[#allocation2 + $0x73] sm:$0x1f] %v856_v8  ;;  %709 = vrot.lane.b32.xlu1 %v704_v5, %s1477_s17  ;;  %v833_v16 = vpop.permute.xlu0 %832 }
  0x97   : > { %v834_v17 = vsel %vm811_vm0, %v831_v11, %v833_v16 }
  0x98   : > { %v788_v14 = vpop.permute.xlu1 %787  ;;  %836 = vst [vmem:[#allocation2 + $0x6e] sm:$0x1f] %v834_v17  ;;  %707 = vrot.lane.b32.xlu0 %v703_v12, %s1477_s17 }
  0x9a   : > { %731 = vrot.lane.b32.xlu1 %v726_v9, %s1477_s17  ;;  %v786_v49 = vpop.permute.xlu0 %785  ;;  %v548_v9 = vmul.f32 %v1744_v29, %v1744_v29  ;;  %v481_v29 = vmul.f32 %v1774_v35, %v1774_v35  ;;  %v503_v35 = vmul.f32 %v1784_v37, %v1784_v37 }
  0x9b   : > { %v789_v19 = vsel %vm744_vm1, %v786_v49, %v788_v14 }
  0x9c   : > { %v810_v18 = vpop.permute.xlu1 %809  ;;  %791 = vst [vmem:[#allocation2 + $0x64] sm:$0x1f] %v789_v19  ;;  %729 = vrot.lane.b32.xlu0 %v725_v10, %s1477_s17  ;;  %v480_v19 = vmul.f32 %v1789_v38, %v1789_v38  ;;  %v458_v38 = vmul.f32 %v1804_v41, %v1804_v41 }
  0x9e   : > { %664 = vrot.lane.b32.xlu1 %v659_v13, %s1478_s27  ;;  %v808_v54 = vpop.permute.xlu0 %807  ;;  %v524_v13 = vmul.f32 %v1779_v36, %v1779_v36  ;;  %v547_v36 = vmul.f32 %v1759_v32, %v1759_v32  ;;  %v436_v32 = vmul.f32 %v1794_v39, %v1794_v39 }
  0x9f   : > { %v812_v21 = vsel %vm811_vm0, %v808_v54, %v810_v18  ;;  %v904_v55 = vld [vmem:[#allocation2 + $0x70] sm:$0xff]  ;;  %v502_v54 = vmul.f32 %v1799_v40, %v1799_v40  ;;  %v391_v40 = vmul.f32 %v1834_v47, %v1834_v47 }
  0xa0   : > { %v766_v51 = vpop.permute.xlu1 %765  ;;  %814 = vst [vmem:[#allocation2 + $0x69] sm:$0x1f] %v812_v21  ;;  %937 = vmatpush1.msra.mxu0 %v904_v55  ;;  %1261 = vmatpush1.msra.mxu1 %v904_v55 }
  0xa1   : > { %662 = vrot.lane.b32.xlu0 %v658_v15, %s1478_s27  ;;  %938 = vmatprep.subr.mxu0 %v1475_v2 }
  0xa2   : > { %687 = vrot.lane.b32.xlu1 %v682_v20, %s1477_s17  ;;  %v764_v23 = vpop.permute.xlu0 %763  ;;  %1231 = vmatprep.subr.mxu1 %v1475_v2 }
  0xa3   : > { %v767_v59 = vsel %vm744_vm1, %v764_v23, %v766_v51 }
  0xa4   : > { %v721_v57 = vpop.permute.xlu1 %720  ;;  %769 = vst [vmem:[#allocation2 + $0x5f] sm:$0x1f] %v767_v59  ;;  %v457_v59 = vmul.f32 %v1819_v44, %v1819_v44 }
  0xa5   : > { %685 = vrot.lane.b32.xlu0 %v681_v58, %s1477_s17  ;;  %s299_s17 = sand.u32 1, %s1448_s19  }
  0xa6   : > { %620 = vrot.lane.b32.xlu1 %v615_v53, %s1478_s27  ;;  %v719_v62 = vpop.permute.xlu0 %718  ;;  %s1069_s13 = scalar_lea.sflag [#allocation4], %s299_s17 }
  0xa7   : > { %v722_v25 = vsel %vm677_vm2, %v719_v62, %v721_v57  ;;  %v903_v63 = vld [vmem:[#allocation2 + $0x68] sm:$0xff]  ;;  %v435_v57 = vmul.f32 %v1809_v42, %v1809_v42  ;;  %v414_v42 = vmul.f32 %v1814_v43, %v1814_v43  ;;  %v347_v43 = vmul.f32 %v1845_v50, %v1845_v50 }
  0xa8   : > { %v743_v60 = vpop.permute.xlu1 %742  ;;  %724 = vst [vmem:[#allocation2 + $0x55] sm:$0x1f] %v722_v25  ;;  %939 = vmatpush1.msra.mxu0 %v903_v63  ;;  %1262 = vmatpush1.msra.mxu1 %v903_v63 }
  0xa9   : > { %618 = vrot.lane.b32.xlu0 %v614_v24, %s1478_s27  ;;  %940 = vmatprep.subr.mxu0 %v1475_v2 }
  0xaa   : > { %642 = vrot.lane.b32.xlu1 %v637_v22, %s1478_s27  ;;  %v741_v31 = vpop.permute.xlu0 %740  ;;  %1232 = vmatprep.subr.mxu1 %v1475_v2 }
  0xab   : > { %v745_v3 = vsel %vm744_vm1, %v741_v31, %v743_v60  ;;  %v902_v4 = vld [vmem:[#allocation2 + $0x60] sm:$0xff] }
  0xac   : > { %v699_v0 = vpop.permute.xlu1 %698  ;;  %747 = vst [vmem:[#allocation2 + $0x5a] sm:$0x1f] %v745_v3  ;;  %941 = vmatpush1.msra.mxu0 %v902_v4  ;;  %1263 = vmatpush1.msra.mxu1 %v902_v4  ;;  %v346_v3 = vmul.f32 %v1863_v56, %v1863_v56  ;;  %v368_v56 = vmul.f32 %v1839_v48, %v1839_v48 }
  0xad   : > { %640 = vrot.lane.b32.xlu0 %v636_v1, %s1478_s27  ;;  %942 = vmatprep.subr.mxu0 %v1475_v2  ;;  %s1212_s27 = sshll.u32 %s299_s17, 3 }
  0xae   : > { %575 = vrot.lane.b32.xlu1 %v570_v61, %s1479_s26  ;;  %v697_v6 = vpop.permute.xlu0 %696  ;;  %1233 = vmatprep.subr.mxu1 %v1475_v2  ;;  %v390_v61 = vmul.f32 %v1850_v52, %v1850_v52  ;;  %v369_v52 = vmul.f32 %v1824_v45, %v1824_v45 }
  0xaf   : > { %v700_v7 = vsel %vm677_vm2, %v697_v6, %v699_v0  ;;  %v413_v0 = vmul.f32 %v1829_v46, %v1829_v46 }
  0xb0   : > { %v654_v5 = vpop.permute.xlu1 %653  ;;  %702 = vst [vmem:[#allocation2 + $0x50] sm:$0x1f] %v700_v7 }
  0xb1   : > { %573 = vrot.lane.b32.xlu0 %v569_v28, %s1479_s26 }
  0xb2   : > { %597 = vrot.lane.b32.xlu1 %v592_v26, %s1479_s26  ;;  %v652_v11 = vpop.permute.xlu0 %651 }
  0xb3   : > { %v655_v33 = vsel %vm610_vm3, %v652_v11, %v654_v5  ;;  %v901_v12 = vld [vmem:[#allocation2 + $0x58] sm:$0xff]  ;;  %v883_v11 = vld [vmem:[%s2195_s3 + $0x8] sm:$0xff] }
  0xb4   : > { %v676_v8 = vpop.permute.xlu1 %675  ;;  %657 = vst [vmem:[#allocation2 + $0x46] sm:$0x1f] %v655_v33  ;;  %943 = vmatpush1.msra.mxu0 %v901_v12  ;;  %1264 = vmatpush1.msra.mxu1 %v901_v12  ;;  %v1060_v33 = vld [vmem:[%s2196_s4] sm:$0xff] }
  0xb5   : > { %595 = vrot.lane.b32.xlu0 %v591_v34, %s1479_s26  ;;  %944 = vmatprep.subr.mxu0 %v1475_v2 }
  0xb6   : > { %530 = vrot.lane.b32.xlu1 %v525_v27, %s1480_s30  ;;  %v674_v30 = vpop.permute.xlu0 %673  ;;  %1234 = vmatprep.subr.mxu1 %v1475_v2  ;;  %v887_v27 = vld [vmem:[%s2195_s3 + $0x28] sm:$0xff] }
  0xb7   : > { %v678_v16 = vsel %vm677_vm2, %v674_v30, %v676_v8  ;;  %v900_v17 = vld [vmem:[#allocation2 + $0x50] sm:$0xff]  ;;  %1221 = vmatprep.mubr.msk.f32.mxu1 %vm921_vm7, %v887_v27  ;;  %1219 = vmatprep.mubr.msk.f32.mxu0 %vm921_vm7, %v883_v11 }
  0xb8   : > { %v609_v14 = vpop.permute.xlu1 %608  ;;  %680 = vst [vmem:[#allocation2 + $0x4b] sm:$0x1f] %v678_v16  ;;  %945 = vmatpush1.msra.mxu0 %v900_v17  ;;  %1265 = vmatpush1.msra.mxu1 %v900_v17 }
  0xb9   : > { %528 = vrot.lane.b32.xlu0 %v524_v13, %s1480_s30  ;;  %946 = vmatprep.subr.mxu0 %v1475_v2 }
  0xba   : > { %553 = vrot.lane.b32.xlu1 %v548_v9, %s1479_s26  ;;  %v607_v18 = vpop.permute.xlu0 %606  ;;  %1235 = vmatprep.subr.mxu1 %v1475_v2 }
  0xbb   : > { %v611_v20 = vsel %vm610_vm3, %v607_v18, %v609_v14  ;;  %v1483_v14 = vmov 0  }
  0xbc   : > { %v632_v10 = vpop.permute.xlu1 %631  ;;  %613 = vst [vmem:[#allocation2 + $0x3c] sm:$0x1f] %v611_v20  ;;  %1373 = vset.pattern.permute.xlu0 %v1483_v14 }
  0xbd   : > { %551 = vrot.lane.b32.xlu0 %v547_v36, %s1479_s26  ;;  %s1225_s26 = sshll.u32 %s1460_s22, 3 }
  0xbe   : > { %486 = vrot.lane.b32.xlu1 %v481_v29, %s1480_s30  ;;  %v630_v51 = vpop.permute.xlu0 %629 }
  0xbf   : > { %v633_v37 = vsel %vm610_vm3, %v630_v51, %v632_v10  ;;  %v899_v15 = vld [vmem:[#allocation2 + $0x48] sm:$0xff] }
  0xc0   : > { %v587_v49 = vpop.permute.xlu1 %586  ;;  %635 = vst [vmem:[#allocation2 + $0x41] sm:$0x1f] %v633_v37  ;;  %947 = vmatpush1.msra.mxu0 %v899_v15  ;;  %1266 = vmatpush1.msra.mxu1 %v899_v15 }
  0xc1   : > { %484 = vrot.lane.b32.xlu0 %v480_v19, %s1480_s30  ;;  %948 = vmatprep.subr.mxu0 %v1475_v2 }
  0xc2   : > { %508 = vrot.lane.b32.xlu1 %v503_v35, %s1480_s30  ;;  %v585_v39 = vpop.permute.xlu0 %584  ;;  %1236 = vmatprep.subr.mxu1 %v1475_v2 }
  0xc3   : > { %v588_v21 = vsel %vm543_vm4, %v585_v39, %v587_v49 }
  0xc4   : > { %v542_v53 = vpop.permute.xlu1 %541  ;;  %590 = vst [vmem:[#allocation2 + $0x37] sm:$0x1f] %v588_v21  ;;  %v920_v21 = vld [vmem:[#allocation2 + $0xf0] sm:$0xff] }
  0xc5   : > { %506 = vrot.lane.b32.xlu0 %v502_v54, %s1480_s30  ;;  %s1080_s30 = sadd.s32 %s1456_s21, %s1225_s26  ;;  %s1484_s21 = smov [#allocation3]  }
  0xc6   : > { %441 = vrot.lane.b32.xlu1 %v436_v32, %s1481_s14  ;;  %v540_v58 = vpop.permute.xlu0 %539  ;;  %s1384_s16 = sshll.u32 %s1484_s21, 4  ;;  %s1385_s16 = int_to_ptr.vmem [resolvable:$false] %s1384_s16 }
  0xc7   : > { %v544_v41 = vsel %vm543_vm4, %v540_v58, %v542_v53  ;;  %v898_v22 = vld [vmem:[#allocation2 + $0x40] sm:$0xff]  ;;  %s1386_s26 = scalar_lea.vmem %s1385_s16, 256 }
  0xc8   : > { %v565_v55 = vpop.permute.xlu1 %564  ;;  %546 = vst [vmem:[#allocation2 + $0x2d] sm:$0x1f] %v544_v41  ;;  %949 = vmatpush1.msra.mxu0 %v898_v22  ;;  %1267 = vmatpush1.msra.mxu1 %v898_v22 }
  0xc9   : > { %439 = vrot.lane.b32.xlu0 %v435_v57, %s1481_s14  ;;  %950 = vmatprep.subr.mxu0 %v1475_v2  ;;  %v919_v57 = vld [vmem:[#allocation2 + $0xe8] sm:$0xff] }
  0xca   : > { %463 = vrot.lane.b32.xlu1 %v458_v38, %s1481_s14  ;;  %v563_v47 = vpop.permute.xlu0 %562  ;;  %1237 = vmatprep.subr.mxu1 %v1475_v2 }
  0xcb   : > { %v566_v60 = vsel %vm543_vm4, %v563_v47, %v565_v55  ;;  %v897_v24 = vld [vmem:[#allocation2 + $0x38] sm:$0xff] }
  0xcc   : > { %v520_v23 = vpop.permute.xlu1 %519  ;;  %568 = vst [vmem:[#allocation2 + $0x32] sm:$0x1f] %v566_v60  ;;  %951 = vmatpush1.msra.mxu0 %v897_v24  ;;  %1268 = vmatpush1.msra.mxu1 %v897_v24 }
  0xcd   : > { %461 = vrot.lane.b32.xlu0 %v457_v59, %s1481_s14  ;;  %952 = vmatprep.subr.mxu0 %v1475_v2 }
  0xce   : > { %396 = vrot.lane.b32.xlu1 %v391_v40, %s1482_s10  ;;  %v518_v62 = vpop.permute.xlu0 %517  ;;  %1238 = vmatprep.subr.mxu1 %v1475_v2 }
  0xcf   : > { %v521_v25 = vsel %vm476_vm5, %v518_v62, %v520_v23 }
  0xd0   : > { %v475_v44 = vpop.permute.xlu1 %474  ;;  %523 = vst [vmem:[#allocation2 + $0x28] sm:$0x1f] %v521_v25 }
  0xd1   : > { %394 = vrot.lane.b32.xlu0 %v390_v61, %s1482_s10 }
  0xd2   : > { %419 = vrot.lane.b32.xlu1 %v414_v42, %s1481_s14  ;;  %v473_v1 = vpop.permute.xlu0 %472 }
  0xd3   : > { %v477_v50 = vsel %vm476_vm5, %v473_v1, %v475_v44  ;;  %v896_v26 = vld [vmem:[#allocation2 + $0x30] sm:$0xff] }
  0xd4   : > { %v498_v63 = vpop.permute.xlu1 %497  ;;  %479 = vst [vmem:[#allocation2 + $0x1e] sm:$0x1f] %v477_v50  ;;  %953 = vmatpush1.msra.mxu0 %v896_v26  ;;  %1269 = vmatpush1.msra.mxu1 %v896_v26 }
  0xd5   : > { %417 = vrot.lane.b32.xlu0 %v413_v0, %s1481_s14  ;;  %954 = vmatprep.subr.mxu0 %v1475_v2  ;;  %s1226_s14 = sshll.u32 %s1080_s30, 7 }
  0xd6   : > { %352 = vrot.lane.b32.xlu1 %v347_v43, %s1482_s10  ;;  %v496_v46 = vpop.permute.xlu0 %495  ;;  %1239 = vmatprep.subr.mxu1 %v1475_v2  ;;  %s1082_s12 = scalar_lea.hbm %s2197_s5, %s1226_s14 }
  0xd7   : > { %v499_v45 = vsel %vm476_vm5, %v496_v46, %v498_v63  ;;  %v895_v4 = vld [vmem:[#allocation2 + $0x28] sm:$0xff] }
  0xd8   : > { %v431_v31 = vpop.permute.xlu1 %430  ;;  %501 = vst [vmem:[#allocation2 + $0x23] sm:$0x1f] %v499_v45  ;;  %955 = vmatpush1.msra.mxu0 %v895_v4  ;;  %1270 = vmatpush1.msra.mxu1 %v895_v4 }
  0xd9   : > { %350 = vrot.lane.b32.xlu0 %v346_v3, %s1482_s10  ;;  %956 = vmatprep.subr.mxu0 %v1475_v2 }
  0xda   : > { %374 = vrot.lane.b32.xlu1 %v369_v52, %s1482_s10  ;;  %v429_v28 = vpop.permute.xlu0 %428  ;;  %1240 = vmatprep.subr.mxu1 %v1475_v2 }
  0xdb   : > { %v432_v6 = vsel %vm409_vm6, %v429_v28, %v431_v31 }
  0xdc   : > { %v453_v5 = vpop.permute.xlu1 %452  ;;  %434 = vst [vmem:[#allocation2 + $0x14] sm:$0x1f] %v432_v6 }
  0xdd   : > { %372 = vrot.lane.b32.xlu0 %v368_v56, %s1482_s10  ;;  %s301_s10 = scalar_lea.vmem [#allocation3], %s1212_s27 }
  0xde   : > { %v451_v48 = vpop.permute.xlu0 %450  ;;  %s1084_s8 = sshll.u32 %s301_s10, 4  ;;  %s1085_s8 = int_to_ptr.vmem [resolvable:$true] %s1084_s8 }
  0xdf   : > { %v454_v8 = vsel %vm409_vm6, %v451_v48, %v453_v5  ;;  %v894_v34 = vld [vmem:[#allocation2 + $0x20] sm:$0xff]  ;;  %s1380_s22 = scalar_lea.vmem %s1085_s8, 128  ;;  %p1387_p6 = scmp.lt.s32.totalorder %s1085_s8, %s1385_s16 }
  0xe0   : > { %v408_v7 = vpop.permute.xlu1 %407  ;;  %456 = vst [vmem:[#allocation2 + $0x19] sm:$0x1f] %v454_v8  ;;  %957 = vmatpush1.msra.mxu0 %v894_v34  ;;  %1271 = vmatpush1.msra.mxu1 %v894_v34  ;;  %p1381_p2 = scmp.ne.s32.totalorder %s1085_s8, %s1380_s22  ;;  %p1388_p7 = scmp.lt.s32.totalorder %s1386_s26, %s1380_s22 }
  0xe1   : > { %958 = vmatprep.subr.mxu0 %v1475_v2  ;;  %1241 = vmatprep.subr.mxu1 %v1475_v2 }
  0xe2   : > { %v406_v12 = vpop.permute.xlu0 %405  ;;  %1063 = vperm.xlu0 %1373, %v1060_v33   ;;  %p1382_p4 = pnand %p1381_p2, %p1566_p3  ;;  %p1389_p9 = por %p1388_p7, %p1387_p6 }
  0xe3   : > { %v410_v13 = vsel %vm409_vm6, %v406_v12, %v408_v7 }
  0xe4   : > { %v364_v9 = vpop.permute.xlu1 %363  ;;  %412 = vst [vmem:[#allocation2 + $0xf] sm:$0x1f] %v410_v13  ;;  %p1383_p5 = pneg %p1382_p4 }
  0xe6   : > { %v362_v30 = vpop.permute.xlu0 %361  ;;  %p1390_p10 = pnand %p1389_p9, %p1383_p5 }
  0xe7   : > { %v365_v16 = vsel %vm342_vm8, %v362_v30, %v364_v9  ;;  %v893_v17 = vld [vmem:[#allocation2 + $0x18] sm:$0xff] }
  0xe8   : > { %v386_v29 = vpop.permute.xlu1 %385  ;;  %367 = vst [vmem:[#allocation2 + $0x5] sm:$0x1f] %v365_v16  ;;  %959 = vmatpush1.msra.mxu0 %v893_v17  ;;  %1272 = vmatpush1.msra.mxu1 %v893_v17 }
  0xe9   : > { %960 = vmatprep.subr.mxu0 %v1475_v2  ;;  %1242 = vmatprep.subr.mxu1 %v1475_v2 }
  0xea   : > { %v384_v36 = vpop.permute.xlu0 %383 }
  0xeb   : > { %v387_v35 = vsel %vm342_vm8, %v384_v36, %v386_v29  ;;  %v892_v18 = vld [vmem:[#allocation2 + $0x10] sm:$0xff] }
  0xec   : > { %v341_v10 = vpop.permute.xlu1 %340  ;;  %389 = vst [vmem:[#allocation2 + $0xa] sm:$0x1f] %v387_v35  ;;  %961 = vmatpush1.msra.mxu0 %v892_v18  ;;  %1273 = vmatpush1.msra.mxu1 %v892_v18 }
  0xed   : > { %962 = vmatprep.subr.mxu0 %v1475_v2  ;;  %1243 = vmatprep.subr.mxu1 %v1475_v2 }
  0xee   : > { %v339_v49 = vpop.permute.xlu0 %338 }
  0xef   : > { %v343_v19 = vsel %vm342_vm8, %v339_v49, %v341_v10 }
  0xf0   : > { %v844_v20 = vpop.permute.xlu1 %843  ;;  %345 = vst [vmem:[#allocation2] sm:$0x1f] %v343_v19 }
  0xf2   : > { %v842_v51 = vpop.permute.xlu0 %841 }
  0xf3   : > { %v845_v37 = vsel %vm811_vm0, %v842_v51, %v844_v20  ;;  %v891_v15 = vld [vmem:[#allocation2 + $0x8] sm:$0xff] }
  0xf4   : > { %v866_v32 = vpop.permute.xlu1 %865  ;;  %847 = vst [vmem:[#allocation2 + $0xdf] sm:$0xf] %v845_v37  ;;  %963 = vmatpush1.msra.mxu0 %v891_v15  ;;  %1274 = vmatpush1.msra.mxu1 %v891_v15 }
  0xf5   : > { %964 = vmatprep.subr.mxu0 %v1475_v2  ;;  %1244 = vmatprep.subr.mxu1 %v1475_v2 }
  0xf6   : > { %v864_v54 = vpop.permute.xlu0 %863 }
  0xf7   : > { %v867_v38 = vsel %vm811_vm0, %v864_v54, %v866_v32  ;;  %v890_v39 = vld [vmem:[#allocation2] sm:$0xff] }
  0xf8   : > { %v799_v53 = vpop.permute.xlu1 %798  ;;  %869 = vst [vmem:[#allocation2 + $0xe3] sm:$0xf] %v867_v38  ;;  %965 = vmatpush1.msra.mxu0 %v890_v39  ;;  %1275 = vmatpush1.msra.mxu1 %v890_v39 }
  0xf9   : > { %968 = vmatprep.subr.mxu0 %v1475_v2  ;;  %1245 = vmatprep.subr.mxu1 %v1475_v2 }
  0xfa   : > { %v797_v40 = vpop.permute.xlu0 %796  ;;  %969 = vmatpush2.msra.mxu0 %v920_v21  ;;  %1276 = vmatpush2.msra.mxu1 %v920_v21 }
  0xfb   : > { %v800_v58 = vsel %vm744_vm1, %v797_v40, %v799_v53  ;;  %970 = vmatprep.subr.mxu0 %v1475_v2  ;;  %1246 = vmatprep.subr.mxu1 %v1475_v2 }
  0xfc   : > { %v822_v55 = vpop.permute.xlu1 %821  ;;  %802 = vst [vmem:[#allocation2 + $0xd7] sm:$0xf] %v800_v58  ;;  %971 = vmatpush2.msra.mxu0 %v919_v57  ;;  %1277 = vmatpush2.msra.mxu1 %v919_v57 }
  0xfd   : > { %972 = vmatprep.subr.mxu0 %v1475_v2  ;;  %1247 = vmatprep.subr.mxu1 %v1475_v2 }
  0xfe   : > { %v820_v22 = vpop.permute.xlu0 %819 }
  0xff   : > { %v823_v23 = vsel %vm811_vm0, %v820_v22, %v822_v55  ;;  %v918_v59 = vld [vmem:[#allocation2 + $0xe0] sm:$0xff] }
 0x100   : > { %v755_v41 = vpop.permute.xlu1 %754  ;;  %825 = vst [vmem:[#allocation2 + $0xdb] sm:$0xf] %v823_v23  ;;  %973 = vmatpush2.msra.mxu0 %v918_v59  ;;  %1278 = vmatpush2.msra.mxu1 %v918_v59 }
 0x101   : > { %974 = vmatprep.subr.mxu0 %v1475_v2  ;;  %1248 = vmatprep.subr.mxu1 %v1475_v2 }
 0x102   : > { %v753_v47 = vpop.permute.xlu0 %752 }
 0x103   : > { %v756_v60 = vsel %vm744_vm1, %v753_v47, %v755_v41 }
 0x104   : > { %v777_v42 = vpop.permute.xlu1 %776  ;;  %758 = vst [vmem:[#allocation2 + $0xcf] sm:$0xf] %v756_v60 }
 0x106   : > { %v775_v44 = vpop.permute.xlu0 %774 }
 0x107   : > { %v778_v61 = vsel %vm744_vm1, %v775_v44, %v777_v42  ;;  %v917_v43 = vld [vmem:[#allocation2 + $0xd8] sm:$0xff] }
 0x108   : > { %v710_v24 = vpop.permute.xlu1 %709  ;;  %780 = vst [vmem:[#allocation2 + $0xd3] sm:$0xf] %v778_v61  ;;  %975 = vmatpush2.msra.mxu0 %v917_v43  ;;  %1279 = vmatpush2.msra.mxu1 %v917_v43 }
 0x109   : > { %976 = vmatprep.subr.mxu0 %v1475_v2  ;;  %1249 = vmatprep.subr.mxu1 %v1475_v2 }
 0x10a   : > { %v708_v25 = vpop.permute.xlu0 %707 }
 0x10b   : > { %v711_v63 = vsel %vm677_vm2, %v708_v25, %v710_v24  ;;  %v882_v25 = vld [vmem:[%s2195_s3] sm:$0xff] }
 0x10c   : > { %v732_v62 = vpop.permute.xlu1 %731  ;;  %713 = vst [vmem:[#allocation2 + $0xc7] sm:$0xf] %v711_v63 }
 0x10e   : > { %v730_v52 = vpop.permute.xlu0 %729 }
 0x10f   : > { %v733_v1 = vsel %vm677_vm2, %v730_v52, %v732_v62  ;;  %v916_v50 = vld [vmem:[#allocation2 + $0xd0] sm:$0xff]  ;;  %v886_v62 = vld [vmem:[%s2195_s3 + $0x20] sm:$0xff]  ;;  %v885_v52 = vld [vmem:[%s2195_s3 + $0x18] sm:$0xff] }
 0x110   : > { %v665_v0 = vpop.permute.xlu1 %664  ;;  %735 = vst [vmem:[#allocation2 + $0xcb] sm:$0xf] %v733_v1  ;;  %977 = vmatpush2.msra.mxu0 %v916_v50  ;;  %1280 = vmatpush2.msra.mxu1 %v916_v50  ;;  %v888_v1 = vld [vmem:[%s2195_s3 + $0x30] sm:$0xff] }
 0x111   : > { %978 = vmatprep.subr.mxu0 %v1475_v2  ;;  %1250 = vmatprep.subr.mxu1 %v1475_v2 }
 0x113   : > { %v663_v31 = vpop.permute.xlu0 %662 }
 0x114   : > { %v688_v26 = vpop.permute.xlu1 %687  ;;  %v666_v3 = vsel %vm610_vm3, %v663_v31, %v665_v0  ;;  %v889_v0 = vld [vmem:[%s2195_s3 + $0x38] sm:$0xff] }
 0x115   : > { %668 = vst [vmem:[#allocation2 + $0xbf] sm:$0xf] %v666_v3 }
 0x117   : > { %v686_v45 = vpop.permute.xlu0 %685  ;;  %v915_v4 = vld [vmem:[#allocation2 + $0xc8] sm:$0xff] }
 0x118   : > { %v621_v46 = vpop.permute.xlu1 %620  ;;  %v689_v5 = vsel %vm677_vm2, %v686_v45, %v688_v26  ;;  %979 = vmatpush2.msra.mxu0 %v915_v4  ;;  %1281 = vmatpush2.msra.mxu1 %v915_v4 }
 0x119   : > { %691 = vst [vmem:[#allocation2 + $0xc3] sm:$0xf] %v689_v5  ;;  %980 = vmatprep.subr.mxu0 %v1475_v2  ;;  %1251 = vmatprep.subr.mxu1 %v1475_v2 }
 0x11b   : > { %v619_v28 = vpop.permute.xlu0 %618 }
 0x11c   : > { %v643_v56 = vpop.permute.xlu1 %642  ;;  %v622_v27 = vsel %vm610_vm3, %v619_v28, %v621_v46 }
 0x11d   : > { %624 = vst [vmem:[#allocation2 + $0xb7] sm:$0xf] %v622_v27 }
 0x11f   : > { %v641_v7 = vpop.permute.xlu0 %640 }
 0x120   : > { %v576_v6 = vpop.permute.xlu1 %575  ;;  %v644_v48 = vsel %vm610_vm3, %v641_v7, %v643_v56  ;;  %v914_v8 = vld [vmem:[#allocation2 + $0xc0] sm:$0xff] }
 0x121   : > { %646 = vst [vmem:[#allocation2 + $0xbb] sm:$0xf] %v644_v48  ;;  %981 = vmatpush2.msra.mxu0 %v914_v8  ;;  %1282 = vmatpush2.msra.mxu1 %v914_v8 }
 0x122   : > { %982 = vmatprep.subr.mxu0 %v1475_v2  ;;  %1252 = vmatprep.subr.mxu1 %v1475_v2 }
 0x123   : > { %v574_v9 = vpop.permute.xlu0 %573 }
 0x124   : > { %v598_v34 = vpop.permute.xlu1 %597  ;;  %v577_v11 = vsel %vm543_vm4, %v574_v9, %v576_v6 }
 0x125   : > { %579 = vst [vmem:[#allocation2 + $0xaf] sm:$0xf] %v577_v11 }
 0x127   : > { %v596_v12 = vpop.permute.xlu0 %595 }
 0x128   : > { %v531_v33 = vpop.permute.xlu1 %530  ;;  %v599_v14 = vsel %vm543_vm4, %v596_v12, %v598_v34  ;;  %v913_v13 = vld [vmem:[#allocation2 + $0xb8] sm:$0xff] }
 0x129   : > { %601 = vst [vmem:[#allocation2 + $0xb3] sm:$0xf] %v599_v14  ;;  %983 = vmatpush2.msra.mxu0 %v913_v13  ;;  %1283 = vmatpush2.msra.mxu1 %v913_v13 }
 0x12a   : > { %984 = vmatprep.subr.mxu0 %v1475_v2  ;;  %1253 = vmatprep.subr.mxu1 %v1475_v2 }
 0x12b   : > { %v529_v30 = vpop.permute.xlu0 %528 }
 0x12c   : > { %v554_v29 = vpop.permute.xlu1 %553  ;;  %v532_v16 = vsel %vm476_vm5, %v529_v30, %v531_v33 }
 0x12d   : > { %534 = vst [vmem:[#allocation2 + $0xa7] sm:$0xf] %v532_v16  ;;  %v1048_v16 = vlaneseq }
 0x12f   : > { %v552_v10 = vpop.permute.xlu0 %551 }
 0x130   : > { %v487_v17 = vpop.permute.xlu1 %486  ;;  %v555_v36 = vsel %vm543_vm4, %v552_v10, %v554_v29  ;;  %v912_v35 = vld [vmem:[#allocation2 + $0xb0] sm:$0xff] }
 0x131   : > { %557 = vst [vmem:[#allocation2 + $0xab] sm:$0xf] %v555_v36  ;;  %985 = vmatpush2.msra.mxu0 %v912_v35  ;;  %1284 = vmatpush2.msra.mxu1 %v912_v35  ;;  %v1049_v35 = vshrl.u32 %v1048_v16, 7 }
 0x132   : > { %986 = vmatprep.subr.mxu0 %v1475_v2  ;;  %1254 = vmatprep.subr.mxu1 %v1475_v2 }
 0x133   : > { %v485_v20 = vpop.permute.xlu0 %484 }
 0x134   : > { %v509_v18 = vpop.permute.xlu1 %508  ;;  %v488_v49 = vsel %vm476_vm5, %v485_v20, %v487_v17 }
 0x135   : > { %490 = vst [vmem:[#allocation2 + $0x9f] sm:$0xf] %v488_v49 }
 0x137   : > { %v507_v32 = vpop.permute.xlu0 %506 }
 0x138   : > { %v442_v19 = vpop.permute.xlu1 %441  ;;  %v510_v51 = vsel %vm476_vm5, %v507_v32, %v509_v18  ;;  %v911_v37 = vld [vmem:[#allocation2 + $0xa8] sm:$0xff]  ;;  %v1050_v18 = vsub.s32 0, %v1049_v35 }
 0x139   : > { %512 = vst [vmem:[#allocation2 + $0xa3] sm:$0xf] %v510_v51  ;;  %987 = vmatpush2.msra.mxu0 %v911_v37  ;;  %1285 = vmatpush2.msra.mxu1 %v911_v37 }
 0x13a   : > { %988 = vmatprep.subr.mxu0 %v1475_v2  ;;  %1255 = vmatprep.subr.mxu1 %v1475_v2 }
 0x13b   : > { %v440_v53 = vpop.permute.xlu0 %439 }
 0x13c   : > { %v464_v15 = vpop.permute.xlu1 %463  ;;  %v443_v54 = vsel %vm409_vm6, %v440_v53, %v442_v19  ;;  %v1056_v19 = vsub.s32 2, %v1049_v35 }
 0x13d   : > { %445 = vst [vmem:[#allocation2 + $0x97] sm:$0xf] %v443_v54 }
 0x13f   : > { %v462_v39 = vpop.permute.xlu0 %461 }
 0x140   : > { %v397_v38 = vpop.permute.xlu1 %396  ;;  %v465_v21 = vsel %vm409_vm6, %v462_v39, %v464_v15  ;;  %v910_v55 = vld [vmem:[#allocation2 + $0xa0] sm:$0xff] }
 0x141   : > { %467 = vst [vmem:[#allocation2 + $0x9b] sm:$0xf] %v465_v21  ;;  %989 = vmatpush2.msra.mxu0 %v910_v55  ;;  %1286 = vmatpush2.msra.mxu1 %v910_v55 }
 0x142   : > { %990 = vmatprep.subr.mxu0 %v1475_v2  ;;  %1256 = vmatprep.subr.mxu1 %v1475_v2 }
 0x143   : > { %v395_v40 = vpop.permute.xlu0 %394 }
 0x144   : > { %v420_v57 = vpop.permute.xlu1 %419  ;;  %v398_v58 = vsel %vm342_vm8, %v395_v40, %v397_v38 }
 0x145   : > { %400 = vst [vmem:[#allocation2 + $0x8f] sm:$0xf] %v398_v58 }
 0x147   : > { %v418_v41 = vpop.permute.xlu0 %417 }
 0x148   : > { %v353_v22 = vpop.permute.xlu1 %352  ;;  %v421_v23 = vsel %vm409_vm6, %v418_v41, %v420_v57  ;;  %v909_v59 = vld [vmem:[#allocation2 + $0x98] sm:$0xff] }
 0x149   : > { %423 = vst [vmem:[#allocation2 + $0x93] sm:$0xf] %v421_v23  ;;  %991 = vmatpush2.msra.mxu0 %v909_v59  ;;  %1287 = vmatpush2.msra.mxu1 %v909_v59 }
 0x14a   : > { %992 = vmatprep.subr.mxu0 %v1475_v2  ;;  %1257 = vmatprep.subr.mxu1 %v1475_v2 }
 0x14b   : > { %v351_v42 = vpop.permute.xlu0 %350 }
 0x14c   : > { %v354_v47 = vsel %vm342_vm8, %v351_v42, %v353_v22  ;;  %v375_v60 = vpop.permute.xlu1 %374 }
 0x14d   : > { %356 = vst [vmem:[#allocation2 + $0x87] sm:$0xf] %v354_v47 }
 0x14f   : > { %v373_v24 = vpop.permute.xlu0 %372 }
 0x150   : > { %v376_v44 = vsel %vm342_vm8, %v373_v24, %v375_v60  ;;  %v908_v61 = vld [vmem:[#allocation2 + $0x90] sm:$0xff] }
 0x151   : > { %378 = vst [vmem:[#allocation2 + $0x8b] sm:$0xf] %v376_v44  ;;  %993 = vmatpush2.msra.mxu0 %v908_v61  ;;  %1288 = vmatpush2.msra.mxu1 %v908_v61 }
 0x152   : > { %994 = vmatprep.subr.mxu0 %v1475_v2  ;;  %1258 = vmatprep.subr.mxu1 %v1475_v2 }
 0x154   : > { %v906_v63 = vld [vmem:[#allocation2 + $0x80] sm:$0xff] }
 0x158   : > { %v907_v43 = vld [vmem:[#allocation2 + $0x88] sm:$0xff] }
 0x159   : > { %995 = vmatpush2.msra.mxu0 %v907_v43  ;;  %1289 = vmatpush2.msra.mxu1 %v907_v43 }
 0x15a   : > { %996 = vmatprep.subr.mxu0 %v1475_v2  ;;  %1259 = vmatprep.subr.mxu1 %v1475_v2  ;;  %v884_v2 = vld [vmem:[%s2195_s3 + $0x10] sm:$0xff] }
 0x15b   : > { %997 = vmatpush2.msra.mxu0 %v906_v63  ;;  %1290 = vmatpush2.msra.mxu1 %v906_v63 }
 0x15c   : > { %1009 = vmatmul.mubr.f32.vlgmr.msra.gmra.mxu1 %v886_v62  ;;  %999 = vmatmul.mubr.f32.vlgmr.msra.gmra.mxu0 %v882_v25 }
 0x15d   : > { %1222 = vmatprep.mubr.msk.f32.mxu1 %vm921_vm7, %v889_v0  ;;  %1220 = vmatprep.mubr.msk.f32.mxu0 %vm921_vm7, %v885_v52  ;;  %v1064_v53 = vpop.permute.xlu0 %1063 }
 0x160   : > { %1014 = vmatmul.mubr.f32.gmra.mxu1 %v888_v1  ;;  %1004 = vmatmul.mubr.f32.gmra.mxu0 %v884_v2 }
 0x21c   : > { %v1010_v50 = vpop.f32.mrf.mxu1  ;;  %v1000_v26 = vpop.f32.mrf.mxu0 }
 0x21e   : > { %v1012_v31 = vpop.f32.mrf.mxu1  ;;  %v1002_v3 = vpop.f32.mrf.mxu0 }
 0x220   : > { %v1015_v46 = vpop.f32.mrf.mxu1  ;;  %v1005_v45 = vpop.f32.mrf.mxu0 }
 0x221   : > { %v1019_v4 = vmul.f32 4.0, %v1015_v46 }
 0x222   : > { %v1017_v5 = vpop.f32.mrf.mxu1  ;;  %v1007_v56 = vpop.f32.mrf.mxu0 }
 0x223   : > { %v1020_v28 = vmax.f32 %v1019_v4, 1.0  ;;  %v1036_v27 = vmax.f32 %v1019_v4, 2.0 }
 0x225   : > { %1374 = vrcp.f32 %v1020_v28  ;;  %v1223_v6 = vadd.f32 -1.0, %v1036_v27  ;;  %v1038_v30 = vrot.slane %v1036_v27, 7 }
 0x227   : > { %1376 = vrcp.f32 %v1223_v6 }
 0x232   : > { %v1375_v7 = vpop.eup %1374 }
 0x233   : > { %v1023_v48 = vrot.slane %v1375_v7, 1  ;;  %v1026_v34 = vrot.slane %v1375_v7, 7 }
 0x234   : > { %v1377_v13 = vpop.eup %1376 }
 0x235   : > { %v1025_v8 = vmul.f32 %v1023_v48, %v1015_v46  ;;  %v1028_v11 = vmul.f32 %v1026_v34, %v1015_v46  ;;  %v1044_v10 = vrot.slane %v1377_v13, 7 }
 0x237   : > { %v1029_v9 = vmul.f32 %v1025_v8, %v1025_v8  ;;  %v1051_v20 = vrot.slane %v1025_v8, %v1050_v18 }
 0x239   : > { %v1031_v33 = vrot.slane %v1029_v9, 6  ;;  %v1052_v49 = vmul.f32 %v1051_v20, %v1005_v45 }
 0x23b   : > { %v1033_v12 = vsub.f32 %v1028_v11, %v1031_v33  ;;  %v1053_v51 = vsub.f32 %v1000_v26, %v1052_v49 }
 0x23d   : > { %v1034_v14 = vmax.f32 %v1033_v12, 0.0 }
 0x23f   : > { %v1035_v29 = vadd.f32 1e-05, %v1034_v14 }
 0x241   : > { %v1040_v17 = vmul.f32 %v1038_v30, %v1035_v29 }
 0x243   : > { %v1046_v36 = vmul.f32 %v1044_v10, %v1040_v17 }
 0x245   : > { %1378 = vrsqrt.f32 %v1046_v36 }
 0x252   : > { %v1379_v32 = vpop.eup %1378 }
 0x253   : > { %v1057_v37 = vrot.slane %v1379_v32, %v1056_v19 }
 0x255   : > { %v1058_v15 = vmul.f32 %v1057_v37, %v1053_v51 }
 0x257   : > { %v1059_v54 = vadd.f32 %v1058_v15, %v1010_v50 }
 0x259   : > { %v1066_v38 = vadd.f32 %v1064_v53, %v1059_v54 }
 0x25b   : > { %1067 = vst [vmem:[%s301_s10] sm:$0xff] %v1066_v38 }
 0x25c   : > { %1393 = shalt.err (!%p1390_p10)
}
 0x25d   : > { %s1394_s27 = scalar_lea.hbm %s1082_s12, 128  ;;  %s1398_s14 = scalar_lea.hbm %s2197_s5, 2048 }
 0x25e   : > { %p1395_p11 = scmp.ne.s32.totalorder %s1082_s12, %s1394_s27  ;;  %p1399_p0 = scmp.lt.s32.totalorder %s1082_s12, %s2197_s5 }
 0x25f   : > { %p1400_p1 = scmp.lt.s32.totalorder %s1398_s14, %s1394_s27 }
 0x260   : > { %p1396_p12 = pnand %p1395_p11, %p1566_p3 }
 0x261   : > { %p1401_p2 = por %p1400_p1, %p1399_p0 }
 0x262   : > { %p1397_p13 = pneg %p1396_p12 }
 0x264   : > { %p1402_p4 = pnand %p1401_p2, %p1397_p13 }
 0x266   : > { %1405 = shalt.err (!%p1402_p4)
}
 0x267   : > { %1292 = dma.vmem_to_hbm [thread:$0]  (%p1566_p3), %s1085_s8, 128, %s1082_s12, %s1069_s13  }
 0x268 PF: > { %p1298_p5 = scmp.ge.s32.totalorder %s1472_s25, 2  ;;  %s1096_s15 = sand.u32 1, %s1444_s18  }
 0x269   : > { %s1097_s22 = scalar_lea.sflag [#allocation4], %s1096_s15 }
 0x26a   : > { %p1295_p6 = pnand %p1298_p5, %p1575_p8 }
 0x26c   : > { %p1296_p7 = pneg %p1295_p6 }
 0x26e   : > { %1439 = dma.done.wait (%p1296_p7), %s1097_s22, 128  }
 0x26f   : > { %1441 = vsyncadd (%p1296_p7), %s1097_s22, 4294967168  ;;  %s18_s25 = sadd.s32 1, %s1472_s25   ;;  %s2203_s18 = smov %s1448_s19 }
 0x270   : > { %p15_p9 = scmp.ge.s32.totalorder %s18_s25, 18   ;;  %s2204_s19 = smov %s1452_s20 }
 0x271   : > { %s2205_s20 = smov %s1584_s11  ;;  %s2206_s21 = smov %s1464_s23 }
 0x272   : > { %s2207_s22 = smov %s1468_s24  ;;  %s2208_s23 = smov %s2211_s28 }
 0x273   : > { %s2209_s24 = smov %s2215_s29  ;;  %17 = sbr.rel (!%p15_p9) target bundleno = 5 (0x5), region = 81 }
 0x278   :  { %1102 = vsyncpa [#allocation4], 1 }
 0x279   :  { %1104 = vsyncpa [#allocation4 + $0x1], 1 }

</bundles_post_ra>
